<compile_context>
chip_gen: v7x
topology: tpu7x:2x2x1
jax: 0.10.0
libtpu: 0.0.40
codegen_flags: <defaults>
</compile_context>

<pallas_src>
import math
import functools

import jax
import jax.numpy as jnp
from jax import lax
from jax.experimental import pallas as pl
from jax.experimental.pallas import tpu as pltpu


# ----------------------------------------------------------------------------
# Tiling helper: largest tile <= target that is a multiple of `align` and
# divides `dim` exactly; fall back to the full dim (always a legal block).
# ----------------------------------------------------------------------------
def _pick_tile(dim, target, align):
    if dim <= target:
        return dim
    t = (target // align) * align
    while t >= align:
        if dim % t == 0:
            return t
        t -= align
    return dim


# ----------------------------------------------------------------------------
# Kernel 1: tiled dense layer  y = x @ Wt + b
#   grid = (M/tm, N/tn, K/tk); f32 accumulator in VMEM; bf16 MXU operands.
# ----------------------------------------------------------------------------
def _linear_kernel(x_ref, wt_ref, b_ref, o_ref, acc_ref):
    # x_ref: (tm, tk) bf16   wt_ref: (tk, tn) bf16   b_ref: (1, tn) f32
    @pl.when(pl.program_id(2) == 0)
    def _():
        acc_ref[...] = jnp.zeros_like(acc_ref)

    acc_ref[...] += jnp.dot(x_ref[...], wt_ref[...],
                            preferred_element_type=jnp.float32)

    @pl.when(pl.program_id(2) == pl.num_programs(2) - 1)
    def _():
        o_ref[...] = (acc_ref[...] + b_ref[...]).astype(o_ref.dtype)


def linear(x, wt, b, *, out_dtype=None, tm=512, tn=256, tk=512):
    """y = x @ wt + b.  x: (M, K); wt: (K, N) (already W^T); b: (N,)."""
    M, K = x.shape
    N = wt.shape[-1]
    out_dtype = out_dtype if out_dtype is not None else x.dtype

    # Robustness: pad rows to a sublane multiple so _pick_tile never falls back
    # to a huge full-M block.
    pad = (-M) % 8
    if pad:
        x = jnp.pad(x, ((0, pad), (0, 0)))
    Mp = M + pad

    tm = _pick_tile(Mp, tm, 8)
    tn = _pick_tile(N, tn, 128)
    tk = _pick_tile(K, tk, 128)
    grid = (Mp // tm, N // tn, K // tk)

    cost = pl.CostEstimate(
        flops=2 * Mp * N * K,
        transcendentals=0,
        bytes_accessed=(Mp * K * x.dtype.itemsize + K * N * wt.dtype.itemsize
                        + N * 4 + Mp * N * jnp.dtype(out_dtype).itemsize),
    )
    out = pl.pallas_call(
        _linear_kernel,
        out_shape=jax.ShapeDtypeStruct((Mp, N), out_dtype),
        grid=grid,
        in_specs=[
            pl.BlockSpec((tm, tk), lambda i, j, k: (i, k)),
            pl.BlockSpec((tk, tn), lambda i, j, k: (k, j)),
            pl.BlockSpec((1, tn), lambda i, j, k: (0, j)),
        ],
        out_specs=pl.BlockSpec((tm, tn), lambda i, j, k: (i, j)),
        scratch_shapes=[pltpu.VMEM((tm, tn), jnp.float32)],
        compiler_params=pltpu.CompilerParams(
            dimension_semantics=("parallel", "parallel", "arbitrary"),
            vmem_limit_bytes=64 * 1024 * 1024,
        ),
        cost_estimate=cost,
    )(x, wt, jnp.asarray(b, jnp.float32).reshape(1, N))
    return out[:M] if pad else out


# ----------------------------------------------------------------------------
# Kernel 2: multi-head scaled-dot-product attention.
#   One grid step = one (batch, q-tile); ALL heads processed inside the step.
#   Head split/merge happens on lane slices of the (tq, H) projection block.
#   K/V blocks have a constant index along the qi axis -> resident, no re-DMA.
# ----------------------------------------------------------------------------
def _attn_kernel(q_ref, k_ref, v_ref, m_ref, scores_ref, out_ref, *, hhead, hbase):
    # q_ref: (1, tq, H) bf16   k_ref/v_ref: (1, Sk, H) bf16
    # m_ref: (1, 1, mq, Sk) f32 (mq == 1 for key-padding masks)
    # scores_ref: (1, hhead, tq, Sk)   out_ref: (1, tq, H)
    q = q_ref[0]                       # already bf16; 1/sqrt(d_k) folded into W_q
    k = k_ref[0]
    v = v_ref[0]
    m = m_ref[0, 0]                    # (mq, Sk) f32; broadcasts over tq rows

    dn = (((1,), (1,)), ((), ()))      # contract last dims: Q @ K^T, no transpose
    # Static head loop (hhead is small); each head's PV result is stored straight
    # into its lane slice of out_ref -> no cross-lane concatenate relayout.
    # TODO(synk): switch to lax.fori_loop with a (tq, H) scratch if hhead is large.
    for h in range(hhead):
        sl = slice(h * hbase, (h + 1) * hbase)
        s = lax.dot_general(q[:, sl], k[:, sl], dn,
                            preferred_element_type=jnp.float32) + m
        scores_ref[0, h] = s.astype(scores_ref.dtype)

        # numerically stable softmax over keys; approx reciprocal -> EUP slot
        s_max = jnp.max(s, axis=-1, keepdims=True)
        p = jnp.exp(s - s_max)
        p = p * pl.reciprocal(jnp.sum(p, axis=-1, keepdims=True), approx=True)

        out_ref[0, :, sl] = jnp.dot(
            p.astype(v.dtype), v[:, sl],
            preferred_element_type=jnp.float32).astype(out_ref.dtype)


def attention(q_p, k_p, v_p, mask_b, *, hhead, hbase,
              scores_dtype=jnp.float32, tq_target=128):
    """q_p: (B,Sq,H) bf16; k_p/v_p: (B,Sk,H) bf16; mask_b: (B,1,mq,Sk) additive."""
    B, Sq, H = q_p.shape
    Sk = k_p.shape[1]
    mq = mask_b.shape[2]               # 1 (key-padding) or Sq (full mask)
    tq = _pick_tile(Sq, tq_target, 8)
    grid = (B, Sq // tq)

    adt = jnp.dtype(q_p.dtype).itemsize
    sdt = jnp.dtype(scores_dtype).itemsize

    # VMEM budget per grid step: double-buffered q/mask/scores/out streams plus
    # the (double-buffered) resident K/V blocks; 2x headroom, clamped to 128 MiB.
    mq_blk = 1 if mq == 1 else tq
    est = (2 * (tq * H * adt + mq_blk * Sk * 4 + hhead * tq * Sk * sdt + tq * H * adt)
           + 2 * 2 * (Sk * H * adt))
    vmem_limit = int(min(128 * 1024 * 1024, max(32 * 1024 * 1024, 2 * est)))

    if mq == 1:
        mask_spec = pl.BlockSpec((1, 1, 1, Sk), lambda b, qi: (b, 0, 0, 0))
    else:
        mask_spec = pl.BlockSpec((1, 1, tq, Sk), lambda b, qi: (b, 0, qi, 0))

    kern = functools.partial(_attn_kernel, hhead=hhead, hbase=hbase)
    cost = pl.CostEstimate(
        flops=4 * B * H * Sq * Sk,
        transcendentals=B * hhead * Sq * Sk,
        bytes_accessed=(B * Sq * H * adt + 2 * B * Sk * H * adt + B * mq * Sk * 4
                        + B * hhead * Sq * Sk * sdt + B * Sq * H * adt),
    )
    scores, atted = pl.pallas_call(
        kern,
        out_shape=(
            jax.ShapeDtypeStruct((B, hhead, Sq, Sk), scores_dtype),
            jax.ShapeDtypeStruct((B, Sq, H), q_p.dtype),
        ),
        grid=grid,
        in_specs=[
            pl.BlockSpec((1, tq, H), lambda b, qi: (b, qi, 0)),
            # K/V block index is constant along qi -> kept resident (no re-DMA).
            # TODO(synk): single-buffer these residents (pl.Buffered(1)) once
            # supported on the pallas_call grid pipeline to halve their VMEM.
            pl.BlockSpec((1, Sk, H), lambda b, qi: (b, 0, 0)),
            pl.BlockSpec((1, Sk, H), lambda b, qi: (b, 0, 0)),
            mask_spec,
        ],
        out_specs=(
            pl.BlockSpec((1, hhead, tq, Sk), lambda b, qi: (b, 0, qi, 0)),
            pl.BlockSpec((1, tq, H), lambda b, qi: (b, qi, 0)),
        ),
        compiler_params=pltpu.CompilerParams(
            dimension_semantics=("parallel", "parallel"),
            vmem_limit_bytes=vmem_limit,
        ),
        cost_estimate=cost,
    )(q_p, k_p, v_p, mask_b)
    return atted, scores


# ----------------------------------------------------------------------------
# Full MHAtt forward
# ----------------------------------------------------------------------------
def mhatt_forward(params, v, k, q, mask, *, hhead, hbase,
                  fuse_qkv=False, scores_dtype=jnp.float32):
    """v,k,q: (B,S,HSIZE); mask additive, broadcastable to (B,1,Sq,Sk) with a
    singleton head dim.  fuse_qkv=True is the self-attention fast path (caller
    passes the same tensor for q/k/v): one projection matmul with Wq|Wk|Wv
    concatenated along N (no activation stacking)."""
    B, Sq, H = q.shape
    Sk = k.shape[1]
    assert hhead * hbase == H

    cdt = jnp.bfloat16                 # MXU operand / activation-stream dtype
    scale = 1.0 / math.sqrt(hbase)     # fold 1/sqrt(d_k) into W_q / b_q

    wt_q = (params["w_q"].T * scale).astype(cdt)
    b_q = params["b_q"] * scale
    wt_k = params["w_k"].T.astype(cdt)
    wt_v = params["w_v"].T.astype(cdt)

    if fuse_qkv:
        wt_qkv = jnp.concatenate([wt_q, wt_k, wt_v], axis=1)              # (H, 3H)
        b_qkv = jnp.concatenate([b_q, params["b_k"], params["b_v"]])
        proj = linear(q.reshape(B * Sq, H).astype(cdt), wt_qkv, b_qkv,
                      out_dtype=cdt)                                       # (B*S, 3H)
        q_p = proj[:, :H].reshape(B, Sq, H)
        k_p = proj[:, H:2 * H].reshape(B, Sk, H)
        v_p = proj[:, 2 * H:].reshape(B, Sk, H)
    else:
        q_p = linear(q.reshape(B * Sq, H).astype(cdt), wt_q, b_q,
                     out_dtype=cdt).reshape(B, Sq, H)
        k_p = linear(k.reshape(B * Sk, H).astype(cdt), wt_k, params["b_k"],
                     out_dtype=cdt).reshape(B, Sk, H)
        v_p = linear(v.reshape(B * Sk, H).astype(cdt), wt_v, params["b_v"],
                     out_dtype=cdt).reshape(B, Sk, H)

    # Additive mask: head-free, and query-free when it is a key-padding mask.
    mf = mask.astype(jnp.float32)
    mq = Sq if (mf.ndim >= 2 and mf.shape[-2] != 1) else 1
    mask_b = jnp.broadcast_to(mf, (B, 1, mq, Sk))

    atted, scores = attention(q_p, k_p, v_p, mask_b, hhead=hhead, hbase=hbase,
                              scores_dtype=scores_dtype)

    # `atted` is (B,Sq,H) bf16 with heads already merged -> feeds dense_merge.
    merged = linear(atted.reshape(B * Sq, H), params["w_m"].T.astype(cdt),
                    params["b_m"], out_dtype=q.dtype).reshape(B, Sq, H)
    # TODO(synk): training-mode dropout on the attention map not implemented
    # (eval-mode identity semantics only).
    return merged, scores


# ----------------------------------------------------------------------------
# Params + pure-JAX reference (for a loose self-check)
# ----------------------------------------------------------------------------
def init_params(key, hsize):
    """nn.Linear-style init: U(-1/sqrt(in), 1/sqrt(in))."""
    bound = 1.0 / math.sqrt(hsize)
    keys = jax.random.split(key, 8)
    u = lambda kk, shape: jax.random.uniform(kk, shape, jnp.float32, -bound, bound)
    return {
        "w_v": u(keys[0], (hsize, hsize)), "b_v": u(keys[1], (hsize,)),
        "w_k": u(keys[2], (hsize, hsize)), "b_k": u(keys[3], (hsize,)),
        "w_q": u(keys[4], (hsize, hsize)), "b_q": u(keys[5], (hsize,)),
        "w_m": u(keys[6], (hsize, hsize)), "b_m": u(keys[7], (hsize,)),
    }


def mhatt_reference(params, v, k, q, mask, *, hhead, hbase):
    B, Sq, H = q.shape
    lin = lambda x, w, b: jnp.einsum("bsh,oh->bso", x, w) + b
    split = lambda x: jnp.transpose(x.reshape(B, -1, hhead, hbase), (0, 2, 1, 3))
    vh = split(lin(v, params["w_v"], params["b_v"]))
    kh = split(lin(k, params["w_k"], params["b_k"]))
    qh = split(lin(q, params["w_q"], params["b_q"]))
    scores = jnp.einsum("bhqd,bhkd->bhqk", qh, kh) / math.sqrt(hbase) + mask
    p = jax.nn.softmax(scores, axis=-1)
    atted = jnp.einsum("bhqk,bhkd->bhqd", p, vh)
    atted = jnp.transpose(atted, (0, 2, 1, 3)).reshape(B, Sq, H)
    merged = lin(atted, params["w_m"], params["b_m"])
    return merged, scores


if __name__ == "__main__":
    # Small config: HSIZE=32, HHEAD=4, HBASE=8, batch=2, seq=8
    B, S, HSIZE, HHEAD = 2, 8, 32, 4
    HBASE = HSIZE // HHEAD

    root = jax.random.PRNGKey(0)
    k_par, k_v, k_k, k_q = jax.random.split(root, 4)

    params = init_params(k_par, HSIZE)
    v_in = jax.random.normal(k_v, (B, S, HSIZE), jnp.float32)
    k_in = jax.random.normal(k_k, (B, S, HSIZE), jnp.float32)
    q_in = jax.random.normal(k_q, (B, S, HSIZE), jnp.float32)

    # additive key-padding mask (B, 1, 1, S): mask the last 2 keys of batch 1
    valid = jnp.ones((B, 1, 1, S), jnp.float32).at[1, :, :, -2:].set(0.0)
    mask = (1.0 - valid) * (-1e9)

    # ---- general path (distinct v / k / q, e.g. cross-attention) -----------
    fwd = jax.jit(functools.partial(mhatt_forward, hhead=HHEAD, hbase=HBASE))
    atted, scores_out = fwd(params, v_in, k_in, q_in, mask)
    jax.block_until_ready((atted, scores_out))

    assert atted.shape == (B, S, HSIZE)
    assert scores_out.shape == (B, HHEAD, S, S)
    assert bool(jnp.all(jnp.isfinite(atted)))

    ref_atted, ref_scores = mhatt_reference(params, v_in, k_in, q_in, mask,
                                            hhead=HHEAD, hbase=HBASE)
    assert bool(jnp.allclose(atted, ref_atted, rtol=5e-2, atol=5e-2))
    assert bool(jnp.allclose(scores_out, ref_scores, rtol=5e-2, atol=5e-2))

    # ---- self-attention fast path: fused Wq|Wk|Wv projection ---------------
    fwd_self = jax.jit(functools.partial(mhatt_forward, hhead=HHEAD, hbase=HBASE,
                                         fuse_qkv=True))
    atted_s, scores_s = fwd_self(params, q_in, q_in, q_in, mask)
    jax.block_until_ready((atted_s, scores_s))
    ref_atted_s, ref_scores_s = mhatt_reference(params, q_in, q_in, q_in, mask,
                                                hhead=HHEAD, hbase=HBASE)
    assert bool(jnp.allclose(atted_s, ref_atted_s, rtol=5e-2, atol=5e-2))
    assert bool(jnp.allclose(scores_s, ref_scores_s, rtol=5e-2, atol=5e-2))

    print("KERNEL_OK")
</pallas_src>

<mosaic_0001>
module attributes {stable_mosaic.version = 11 : i64} {
  func.func @_linear_kernel(%arg0: i32, %arg1: i32, %arg2: i32, %arg3: memref<16x32xbf16, #tpu.memory_space<vmem>>, %arg4: memref<32x32xbf16, #tpu.memory_space<vmem>>, %arg5: memref<1x32xf32, #tpu.memory_space<vmem>>, %arg6: memref<16x32xbf16, #tpu.memory_space<vmem>>, %arg7: memref<16x32xf32, #tpu.memory_space<vmem>>) attributes {dimension_semantics = [#tpu.dimension_semantics<parallel>, #tpu.dimension_semantics<parallel>, #tpu.dimension_semantics<arbitrary>], iteration_bounds = array<i64: 1, 1, 1>, scalar_prefetch = 0 : i64, scratch_operands = 1 : i64, tpu.core_type = #tpu.core_type<tc>, window_params = [{transform_indices = @transform_0, window_bounds = array<i64: 16, 32>}, {transform_indices = @transform_1, window_bounds = array<i64: 32, 32>}, {transform_indices = @transform_2, window_bounds = array<i64: 1, 32>}, {transform_indices = @transform_3, window_bounds = array<i64: 16, 32>}]} {
    %c0_i32 = arith.constant 0 : i32
    %0 = arith.cmpi eq, %arg2, %c0_i32 : i32
    %1 = arith.extui %0 : i1 to i32
    %c0_i32_0 = arith.constant 0 : i32
    %2 = arith.cmpi ne, %1, %c0_i32_0 : i32
    scf.if %2 {
      %cst_10 = arith.constant 0.000000e+00 : f32
      %12 = vector.broadcast %cst_10 : f32 to vector<16x32xf32>
      %c0_11 = arith.constant 0 : index
      %c0_12 = arith.constant 0 : index
      %13 = vector.load %arg7[%c0_11, %c0_12] : memref<16x32xf32, #tpu.memory_space<vmem>>, vector<16x32xf32>
      tpu.vector_store %arg7[%c0_11, %c0_12], %12 {strides = array<i32>} : memref<16x32xf32, #tpu.memory_space<vmem>>, vector<16x32xf32>,
    } else {
    }
    %c0 = arith.constant 0 : index
    %c0_1 = arith.constant 0 : index
    %3 = vector.load %arg7[%c0, %c0_1] : memref<16x32xf32, #tpu.memory_space<vmem>>, vector<16x32xf32>
    %c0_2 = arith.constant 0 : index
    %c0_3 = arith.constant 0 : index
    %4 = vector.load %arg3[%c0_2, %c0_3] : memref<16x32xbf16, #tpu.memory_space<vmem>>, vector<16x32xbf16>
    %c0_4 = arith.constant 0 : index
    %c0_5 = arith.constant 0 : index
    %5 = vector.load %arg4[%c0_4, %c0_5] : memref<32x32xbf16, #tpu.memory_space<vmem>>, vector<32x32xbf16>
    %cst = arith.constant dense<0.000000e+00> : vector<16x32xf32>
    %6 = tpu.matmul %4, %5, %cst {dimension_numbers = #tpu.dot_dimension_numbers<[1], [0], [0], [1], [0, 0, 1, 1], [], []>} : vector<16x32xbf16>, vector<32x32xbf16>, vector<16x32xf32> -> vector<16x32xf32>
    %7 = arith.addf %3, %6 : vector<16x32xf32>
    %c0_6 = arith.constant 0 : index
    %c0_7 = arith.constant 0 : index
    %8 = vector.load %arg7[%c0_6, %c0_7] : memref<16x32xf32, #tpu.memory_space<vmem>>, vector<16x32xf32>
    tpu.vector_store %arg7[%c0_6, %c0_7], %7 {strides = array<i32>} : memref<16x32xf32, #tpu.memory_space<vmem>>, vector<16x32xf32>,
    %c0_i32_8 = arith.constant 0 : i32
    %9 = arith.cmpi eq, %arg2, %c0_i32_8 : i32
    %10 = arith.extui %9 : i1 to i32
    %c0_i32_9 = arith.constant 0 : i32
    %11 = arith.cmpi ne, %10, %c0_i32_9 : i32
    scf.if %11 {
      %c0_10 = arith.constant 0 : index
      %c0_11 = arith.constant 0 : index
      %12 = vector.load %arg7[%c0_10, %c0_11] : memref<16x32xf32, #tpu.memory_space<vmem>>, vector<16x32xf32>
      %c0_12 = arith.constant 0 : index
      %c0_13 = arith.constant 0 : index
      %13 = vector.load %arg5[%c0_12, %c0_13] : memref<1x32xf32, #tpu.memory_space<vmem>>, vector<1x32xf32>
      %14 = vector.broadcast %13 : vector<1x32xf32> to vector<16x32xf32>
      %15 = arith.addf %12, %14 : vector<16x32xf32>
      %16 = arith.truncf %15 : vector<16x32xf32> to vector<16x32xbf16>
      %c0_14 = arith.constant 0 : index
      %c0_15 = arith.constant 0 : index
      %17 = vector.load %arg6[%c0_14, %c0_15] : memref<16x32xbf16, #tpu.memory_space<vmem>>, vector<16x32xbf16>
      tpu.vector_store %arg6[%c0_14, %c0_15], %16 {strides = array<i32>} : memref<16x32xbf16, #tpu.memory_space<vmem>>, vector<16x32xbf16>,
    } else {
    }
    return
  }
  func.func @transform_0(%arg0: i32, %arg1: i32, %arg2: i32) -> (i32, i32) {
    %c0_i32 = arith.constant 0 : i32
    return %arg0, %arg2 : i32, i32
  }
  func.func @transform_1(%arg0: i32, %arg1: i32, %arg2: i32) -> (i32, i32) {
    %c0_i32 = arith.constant 0 : i32
    return %arg2, %arg1 : i32, i32
  }
  func.func @transform_2(%arg0: i32, %arg1: i32, %arg2: i32) -> (i32, i32) {
    %c0_i32 = arith.constant 0 : i32
    %c0_i32_0 = arith.constant 0 : i32
    return %c0_i32, %arg1 : i32, i32
  }
  func.func @transform_3(%arg0: i32, %arg1: i32, %arg2: i32) -> (i32, i32) {
    %c0_i32 = arith.constant 0 : i32
    return %arg0, %arg1 : i32, i32
  }
}

module attributes {stable_mosaic.version = 11 : i64} {
  func.func @_attn_kernel(%arg0: i32, %arg1: i32, %arg2: memref<1x8x32xbf16, #tpu.memory_space<vmem>>, %arg3: memref<1x8x32xbf16, #tpu.memory_space<vmem>>, %arg4: memref<1x8x32xbf16, #tpu.memory_space<vmem>>, %arg5: memref<1x1x1x8xf32, #tpu.memory_space<vmem>>, %arg6: memref<1x4x8x8xf32, #tpu.memory_space<vmem>>, %arg7: memref<1x8x32xbf16, #tpu.memory_space<vmem>>) attributes {dimension_semantics = [#tpu.dimension_semantics<parallel>, #tpu.dimension_semantics<parallel>], iteration_bounds = array<i64: 2, 1>, scalar_prefetch = 0 : i64, scratch_operands = 0 : i64, tpu.core_type = #tpu.core_type<tc>, window_params = [{transform_indices = @transform_0, window_bounds = array<i64: 1, 8, 32>}, {transform_indices = @transform_1, window_bounds = array<i64: 1, 8, 32>}, {transform_indices = @transform_2, window_bounds = array<i64: 1, 8, 32>}, {transform_indices = @transform_3, window_bounds = array<i64: 1, 1, 1, 8>}, {transform_indices = @transform_4, window_bounds = array<i64: 1, 4, 8, 8>}, {transform_indices = @transform_5, window_bounds = array<i64: 1, 8, 32>}]} {
    %c0 = arith.constant 0 : index
    %c0_0 = arith.constant 0 : index
    %c0_1 = arith.constant 0 : index
    %0 = vector.load %arg2[%c0, %c0_0, %c0_1] : memref<1x8x32xbf16, #tpu.memory_space<vmem>>, vector<1x8x32xbf16>
    %1 = vector.shape_cast %0 : vector<1x8x32xbf16> to vector<8x32xbf16>
    %c0_2 = arith.constant 0 : index
    %c0_3 = arith.constant 0 : index
    %c0_4 = arith.constant 0 : index
    %2 = vector.load %arg3[%c0_2, %c0_3, %c0_4] : memref<1x8x32xbf16, #tpu.memory_space<vmem>>, vector<1x8x32xbf16>
    %3 = vector.shape_cast %2 : vector<1x8x32xbf16> to vector<8x32xbf16>
    %c0_5 = arith.constant 0 : index
    %c0_6 = arith.constant 0 : index
    %c0_7 = arith.constant 0 : index
    %4 = vector.load %arg4[%c0_5, %c0_6, %c0_7] : memref<1x8x32xbf16, #tpu.memory_space<vmem>>, vector<1x8x32xbf16>
    %5 = vector.shape_cast %4 : vector<1x8x32xbf16> to vector<8x32xbf16>
    %c0_8 = arith.constant 0 : index
    %c0_9 = arith.constant 0 : index
    %c0_10 = arith.constant 0 : index
    %c0_11 = arith.constant 0 : index
    %6 = vector.load %arg5[%c0_8, %c0_9, %c0_10, %c0_11] : memref<1x1x1x8xf32, #tpu.memory_space<vmem>>, vector<1x1x1x8xf32>
    %7 = vector.shape_cast %6 : vector<1x1x1x8xf32> to vector<1x8xf32>
    %8 = vector.extract_strided_slice %1 {offsets = [0, 0], sizes = [8, 8], strides = [1, 1]} : vector<8x32xbf16> to vector<8x8xbf16>
    %9 = vector.extract_strided_slice %3 {offsets = [0, 0], sizes = [8, 8], strides = [1, 1]} : vector<8x32xbf16> to vector<8x8xbf16>
    %cst = arith.constant dense<0.000000e+00> : vector<8x8xf32>
    %10 = tpu.matmul %8, %9, %cst {dimension_numbers = #tpu.dot_dimension_numbers<[1], [1], [0], [0], [0, 0, 1, 0], [], []>} : vector<8x8xbf16>, vector<8x8xbf16>, vector<8x8xf32> -> vector<8x8xf32>
    %11 = vector.broadcast %7 : vector<1x8xf32> to vector<8x8xf32>
    %12 = arith.addf %10, %11 : vector<8x8xf32>
    %c0_12 = arith.constant 0 : index
    %c0_13 = arith.constant 0 : index
    %c0_14 = arith.constant 0 : index
    %c0_15 = arith.constant 0 : index
    %13 = vector.load %arg6[%c0_12, %c0_13, %c0_14, %c0_15] : memref<1x4x8x8xf32, #tpu.memory_space<vmem>>, vector<1x1x8x8xf32>
    %14 = vector.shape_cast %13 : vector<1x1x8x8xf32> to vector<8x8xf32>
    %15 = vector.shape_cast %12 : vector<8x8xf32> to vector<1x1x8x8xf32>
    tpu.vector_store %arg6[%c0_12, %c0_13, %c0_14, %c0_15], %15 {strides = array<i32>} : memref<1x4x8x8xf32, #tpu.memory_space<vmem>>, vector<1x1x8x8xf32>,
    %cst_16 = arith.constant dense<0xFF800000> : vector<8xf32>
    %16 = vector.multi_reduction <maximumf>, %12, %cst_16 [1] : vector<8x8xf32> to vector<8xf32>
    %17 = vector.shape_cast %16 : vector<8xf32> to vector<8x1xf32>
    %18 = vector.broadcast %17 : vector<8x1xf32> to vector<8x8xf32>
    %19 = arith.subf %12, %18 : vector<8x8xf32>
    %20 = math.exp %19 : vector<8x8xf32>
    %cst_17 = arith.constant dense<0.000000e+00> : vector<8xf32>
    %21 = vector.multi_reduction <add>, %20, %cst_17 [1] : vector<8x8xf32> to vector<8xf32>
    %22 = vector.shape_cast %21 : vector<8xf32> to vector<8x1xf32>
    %23 = tpu.reciprocal %22 {approx = true} : vector<8x1xf32> -> vector<8x1xf32>
    %24 = vector.broadcast %23 : vector<8x1xf32> to vector<8x8xf32>
    %25 = arith.mulf %20, %24 : vector<8x8xf32>
    %26 = arith.truncf %25 : vector<8x8xf32> to vector<8x8xbf16>
    %27 = vector.extract_strided_slice %5 {offsets = [0, 0], sizes = [8, 8], strides = [1, 1]} : vector<8x32xbf16> to vector<8x8xbf16>
    %cst_18 = arith.constant dense<0.000000e+00> : vector<8x8xf32>
    %28 = tpu.matmul %26, %27, %cst_18 {dimension_numbers = #tpu.dot_dimension_numbers<[1], [0], [0], [1], [0, 0, 1, 1], [], []>} : vector<8x8xbf16>, vector<8x8xbf16>, vector<8x8xf32> -> vector<8x8xf32>
    %29 = arith.truncf %28 : vector<8x8xf32> to vector<8x8xbf16>
    %c0_19 = arith.constant 0 : index
    %c0_20 = arith.constant 0 : index
    %c0_21 = arith.constant 0 : index
    %30 = vector.load %arg7[%c0_19, %c0_20, %c0_21] : memref<1x8x32xbf16, #tpu.memory_space<vmem>>, vector<1x8x8xbf16>
    %31 = vector.shape_cast %30 : vector<1x8x8xbf16> to vector<8x8xbf16>
    %32 = vector.shape_cast %29 : vector<8x8xbf16> to vector<1x8x8xbf16>
    tpu.vector_store %arg7[%c0_19, %c0_20, %c0_21], %32 {strides = array<i32>} : memref<1x8x32xbf16, #tpu.memory_space<vmem>>, vector<1x8x8xbf16>,
    %33 = vector.extract_strided_slice %1 {offsets = [0, 8], sizes = [8, 8], strides = [1, 1]} : vector<8x32xbf16> to vector<8x8xbf16>
    %34 = vector.extract_strided_slice %3 {offsets = [0, 8], sizes = [8, 8], strides = [1, 1]} : vector<8x32xbf16> to vector<8x8xbf16>
    %cst_22 = arith.constant dense<0.000000e+00> : vector<8x8xf32>
    %35 = tpu.matmul %33, %34, %cst_22 {dimension_numbers = #tpu.dot_dimension_numbers<[1], [1], [0], [0], [0, 0, 1, 0], [], []>} : vector<8x8xbf16>, vector<8x8xbf16>, vector<8x8xf32> -> vector<8x8xf32>
    %36 = vector.broadcast %7 : vector<1x8xf32> to vector<8x8xf32>
    %37 = arith.addf %35, %36 : vector<8x8xf32>
    %c0_23 = arith.constant 0 : index
    %c1 = arith.constant 1 : index
    %c0_24 = arith.constant 0 : index
    %c0_25 = arith.constant 0 : index
    %38 = vector.load %arg6[%c0_23, %c1, %c0_24, %c0_25] : memref<1x4x8x8xf32, #tpu.memory_space<vmem>>, vector<1x1x8x8xf32>
    %39 = vector.shape_cast %38 : vector<1x1x8x8xf32> to vector<8x8xf32>
    %40 = vector.shape_cast %37 : vector<8x8xf32> to vector<1x1x8x8xf32>
    tpu.vector_store %arg6[%c0_23, %c1, %c0_24, %c0_25], %40 {strides = array<i32>} : memref<1x4x8x8xf32, #tpu.memory_space<vmem>>, vector<1x1x8x8xf32>,
    %cst_26 = arith.constant dense<0xFF800000> : vector<8xf32>
    %41 = vector.multi_reduction <maximumf>, %37, %cst_26 [1] : vector<8x8xf32> to vector<8xf32>
    %42 = vector.shape_cast %41 : vector<8xf32> to vector<8x1xf32>
    %43 = vector.broadcast %42 : vector<8x1xf32> to vector<8x8xf32>
    %44 = arith.subf %37, %43 : vector<8x8xf32>
    %45 = math.exp %44 : vector<8x8xf32>
    %cst_27 = arith.constant dense<0.000000e+00> : vector<8xf32>
    %46 = vector.multi_reduction <add>, %45, %cst_27 [1] : vector<8x8xf32> to vector<8xf32>
    %47 = vector.shape_cast %46 : vector<8xf32> to vector<8x1xf32>
    %48 = tpu.reciprocal %47 {approx = true} : vector<8x1xf32> -> vector<8x1xf32>
    %49 = vector.broadcast %48 : vector<8x1xf32> to vector<8x8xf32>
    %50 = arith.mulf %45, %49 : vector<8x8xf32>
    %51 = arith.truncf %50 : vector<8x8xf32> to vector<8x8xbf16>
    %52 = vector.extract_strided_slice %5 {offsets = [0, 8], sizes = [8, 8], strides = [1, 1]} : vector<8x32xbf16> to vector<8x8xbf16>
    %cst_28 = arith.constant dense<0.000000e+00> : vector<8x8xf32>
    %53 = tpu.matmul %51, %52, %cst_28 {dimension_numbers = #tpu.dot_dimension_numbers<[1], [0], [0], [1], [0, 0, 1, 1], [], []>} : vector<8x8xbf16>, vector<8x8xbf16>, vector<8x8xf32> -> vector<8x8xf32>
    %54 = arith.truncf %53 : vector<8x8xf32> to vector<8x8xbf16>
    %c0_29 = arith.constant 0 : index
    %c0_30 = arith.constant 0 : index
    %c8 = arith.constant 8 : index
    %55 = vector.load %arg7[%c0_29, %c0_30, %c8] : memref<1x8x32xbf16, #tpu.memory_space<vmem>>, vector<1x8x8xbf16>
    %56 = vector.shape_cast %55 : vector<1x8x8xbf16> to vector<8x8xbf16>
    %57 = vector.shape_cast %54 : vector<8x8xbf16> to vector<1x8x8xbf16>
    tpu.vector_store %arg7[%c0_29, %c0_30, %c8], %57 {strides = array<i32>} : memref<1x8x32xbf16, #tpu.memory_space<vmem>>, vector<1x8x8xbf16>,
    %58 = vector.extract_strided_slice %1 {offsets = [0, 16], sizes = [8, 8], strides = [1, 1]} : vector<8x32xbf16> to vector<8x8xbf16>
    %59 = vector.extract_strided_slice %3 {offsets = [0, 16], sizes = [8, 8], strides = [1, 1]} : vector<8x32xbf16> to vector<8x8xbf16>
    %cst_31 = arith.constant dense<0.000000e+00> : vector<8x8xf32>
    %60 = tpu.matmul %58, %59, %cst_31 {dimension_numbers = #tpu.dot_dimension_numbers<[1], [1], [0], [0], [0, 0, 1, 0], [], []>} : vector<8x8xbf16>, vector<8x8xbf16>, vector<8x8xf32> -> vector<8x8xf32>
    %61 = vector.broadcast %7 : vector<1x8xf32> to vector<8x8xf32>
    %62 = arith.addf %60, %61 : vector<8x8xf32>
    %c0_32 = arith.constant 0 : index
    %c2 = arith.constant 2 : index
    %c0_33 = arith.constant 0 : index
    %c0_34 = arith.constant 0 : index
    %63 = vector.load %arg6[%c0_32, %c2, %c0_33, %c0_34] : memref<1x4x8x8xf32, #tpu.memory_space<vmem>>, vector<1x1x8x8xf32>
    %64 = vector.shape_cast %63 : vector<1x1x8x8xf32> to vector<8x8xf32>
    %65 = vector.shape_cast %62 : vector<8x8xf32> to vector<1x1x8x8xf32>
    tpu.vector_store %arg6[%c0_32, %c2, %c0_33, %c0_34], %65 {strides = array<i32>} : memref<1x4x8x8xf32, #tpu.memory_space<vmem>>, vector<1x1x8x8xf32>,
    %cst_35 = arith.constant dense<0xFF800000> : vector<8xf32>
    %66 = vector.multi_reduction <maximumf>, %62, %cst_35 [1] : vector<8x8xf32> to vector<8xf32>
    %67 = vector.shape_cast %66 : vector<8xf32> to vector<8x1xf32>
    %68 = vector.broadcast %67 : vector<8x1xf32> to vector<8x8xf32>
    %69 = arith.subf %62, %68 : vector<8x8xf32>
    %70 = math.exp %69 : vector<8x8xf32>
    %cst_36 = arith.constant dense<0.000000e+00> : vector<8xf32>
    %71 = vector.multi_reduction <add>, %70, %cst_36 [1] : vector<8x8xf32> to vector<8xf32>
    %72 = vector.shape_cast %71 : vector<8xf32> to vector<8x1xf32>
    %73 = tpu.reciprocal %72 {approx = true} : vector<8x1xf32> -> vector<8x1xf32>
    %74 = vector.broadcast %73 : vector<8x1xf32> to vector<8x8xf32>
    %75 = arith.mulf %70, %74 : vector<8x8xf32>
    %76 = arith.truncf %75 : vector<8x8xf32> to vector<8x8xbf16>
    %77 = vector.extract_strided_slice %5 {offsets = [0, 16], sizes = [8, 8], strides = [1, 1]} : vector<8x32xbf16> to vector<8x8xbf16>
    %cst_37 = arith.constant dense<0.000000e+00> : vector<8x8xf32>
    %78 = tpu.matmul %76, %77, %cst_37 {dimension_numbers = #tpu.dot_dimension_numbers<[1], [0], [0], [1], [0, 0, 1, 1], [], []>} : vector<8x8xbf16>, vector<8x8xbf16>, vector<8x8xf32> -> vector<8x8xf32>
    %79 = arith.truncf %78 : vector<8x8xf32> to vector<8x8xbf16>
    %c0_38 = arith.constant 0 : index
    %c0_39 = arith.constant 0 : index
    %c16 = arith.constant 16 : index
    %80 = vector.load %arg7[%c0_38, %c0_39, %c16] : memref<1x8x32xbf16, #tpu.memory_space<vmem>>, vector<1x8x8xbf16>
    %81 = vector.shape_cast %80 : vector<1x8x8xbf16> to vector<8x8xbf16>
    %82 = vector.shape_cast %79 : vector<8x8xbf16> to vector<1x8x8xbf16>
    tpu.vector_store %arg7[%c0_38, %c0_39, %c16], %82 {strides = array<i32>} : memref<1x8x32xbf16, #tpu.memory_space<vmem>>, vector<1x8x8xbf16>,
    %83 = vector.extract_strided_slice %1 {offsets = [0, 24], sizes = [8, 8], strides = [1, 1]} : vector<8x32xbf16> to vector<8x8xbf16>
    %84 = vector.extract_strided_slice %3 {offsets = [0, 24], sizes = [8, 8], strides = [1, 1]} : vector<8x32xbf16> to vector<8x8xbf16>
    %cst_40 = arith.constant dense<0.000000e+00> : vector<8x8xf32>
    %85 = tpu.matmul %83, %84, %cst_40 {dimension_numbers = #tpu.dot_dimension_numbers<[1], [1], [0], [0], [0, 0, 1, 0], [], []>} : vector<8x8xbf16>, vector<8x8xbf16>, vector<8x8xf32> -> vector<8x8xf32>
    %86 = vector.broadcast %7 : vector<1x8xf32> to vector<8x8xf32>
    %87 = arith.addf %85, %86 : vector<8x8xf32>
    %c0_41 = arith.constant 0 : index
    %c3 = arith.constant 3 : index
    %c0_42 = arith.constant 0 : index
    %c0_43 = arith.constant 0 : index
    %88 = vector.load %arg6[%c0_41, %c3, %c0_42, %c0_43] : memref<1x4x8x8xf32, #tpu.memory_space<vmem>>, vector<1x1x8x8xf32>
    %89 = vector.shape_cast %88 : vector<1x1x8x8xf32> to vector<8x8xf32>
    %90 = vector.shape_cast %87 : vector<8x8xf32> to vector<1x1x8x8xf32>
    tpu.vector_store %arg6[%c0_41, %c3, %c0_42, %c0_43], %90 {strides = array<i32>} : memref<1x4x8x8xf32, #tpu.memory_space<vmem>>, vector<1x1x8x8xf32>,
    %cst_44 = arith.constant dense<0xFF800000> : vector<8xf32>
    %91 = vector.multi_reduction <maximumf>, %87, %cst_44 [1] : vector<8x8xf32> to vector<8xf32>
    %92 = vector.shape_cast %91 : vector<8xf32> to vector<8x1xf32>
    %93 = vector.broadcast %92 : vector<8x1xf32> to vector<8x8xf32>
    %94 = arith.subf %87, %93 : vector<8x8xf32>
    %95 = math.exp %94 : vector<8x8xf32>
    %cst_45 = arith.constant dense<0.000000e+00> : vector<8xf32>
    %96 = vector.multi_reduction <add>, %95, %cst_45 [1] : vector<8x8xf32> to vector<8xf32>
    %97 = vector.shape_cast %96 : vector<8xf32> to vector<8x1xf32>
    %98 = tpu.reciprocal %97 {approx = true} : vector<8x1xf32> -> vector<8x1xf32>
    %99 = vector.broadcast %98 : vector<8x1xf32> to vector<8x8xf32>
    %100 = arith.mulf %95, %99 : vector<8x8xf32>
    %101 = arith.truncf %100 : vector<8x8xf32> to vector<8x8xbf16>
    %102 = vector.extract_strided_slice %5 {offsets = [0, 24], sizes = [8, 8], strides = [1, 1]} : vector<8x32xbf16> to vector<8x8xbf16>
    %cst_46 = arith.constant dense<0.000000e+00> : vector<8x8xf32>
    %103 = tpu.matmul %101, %102, %cst_46 {dimension_numbers = #tpu.dot_dimension_numbers<[1], [0], [0], [1], [0, 0, 1, 1], [], []>} : vector<8x8xbf16>, vector<8x8xbf16>, vector<8x8xf32> -> vector<8x8xf32>
    %104 = arith.truncf %103 : vector<8x8xf32> to vector<8x8xbf16>
    %c0_47 = arith.constant 0 : index
    %c0_48 = arith.constant 0 : index
    %c24 = arith.constant 24 : index
    %105 = vector.load %arg7[%c0_47, %c0_48, %c24] : memref<1x8x32xbf16, #tpu.memory_space<vmem>>, vector<1x8x8xbf16>
    %106 = vector.shape_cast %105 : vector<1x8x8xbf16> to vector<8x8xbf16>
    %107 = vector.shape_cast %104 : vector<8x8xbf16> to vector<1x8x8xbf16>
    tpu.vector_store %arg7[%c0_47, %c0_48, %c24], %107 {strides = array<i32>} : memref<1x8x32xbf16, #tpu.memory_space<vmem>>, vector<1x8x8xbf16>,
    return
  }
  func.func @transform_0(%arg0: i32, %arg1: i32) -> (i32, i32, i32) {
    %c0_i32 = arith.constant 0 : i32
    %c0_i32_0 = arith.constant 0 : i32
    return %arg0, %arg1, %c0_i32 : i32, i32, i32
  }
  func.func @transform_1(%arg0: i32, %arg1: i32) -> (i32, i32, i32) {
    %c0_i32 = arith.constant 0 : i32
    %c0_i32_0 = arith.constant 0 : i32
    %c0_i32_1 = arith.constant 0 : i32
    return %arg0, %c0_i32, %c0_i32_0 : i32, i32, i32
  }
  func.func @transform_2(%arg0: i32, %arg1: i32) -> (i32, i32, i32) {
    %c0_i32 = arith.constant 0 : i32
    %c0_i32_0 = arith.constant 0 : i32
    %c0_i32_1 = arith.constant 0 : i32
    return %arg0, %c0_i32, %c0_i32_0 : i32, i32, i32
  }
  func.func @transform_3(%arg0: i32, %arg1: i32) -> (i32, i32, i32, i32) {
    %c0_i32 = arith.constant 0 : i32
    %c0_i32_0 = arith.constant 0 : i32
    %c0_i32_1 = arith.constant 0 : i32
    %c0_i32_2 = arith.constant 0 : i32
    return %arg0, %c0_i32, %c0_i32_0, %c0_i32_1 : i32, i32, i32, i32
  }
  func.func @transform_4(%arg0: i32, %arg1: i32) -> (i32, i32, i32, i32) {
    %c0_i32 = arith.constant 0 : i32
    %c0_i32_0 = arith.constant 0 : i32
    %c0_i32_1 = arith.constant 0 : i32
    return %arg0, %c0_i32, %arg1, %c0_i32_0 : i32, i32, i32, i32
  }
  func.func @transform_5(%arg0: i32, %arg1: i32) -> (i32, i32, i32) {
    %c0_i32 = arith.constant 0 : i32
    %c0_i32_0 = arith.constant 0 : i32
    return %arg0, %arg1, %c0_i32 : i32, i32, i32
  }
}

module attributes {stable_mosaic.version = 11 : i64} {
  func.func @_linear_kernel(%arg0: i32, %arg1: i32, %arg2: i32, %arg3: memref<16x32xbf16, #tpu.memory_space<vmem>>, %arg4: memref<32x32xbf16, #tpu.memory_space<vmem>>, %arg5: memref<1x32xf32, #tpu.memory_space<vmem>>, %arg6: memref<16x32xf32, #tpu.memory_space<vmem>>, %arg7: memref<16x32xf32, #tpu.memory_space<vmem>>) attributes {dimension_semantics = [#tpu.dimension_semantics<parallel>, #tpu.dimension_semantics<parallel>, #tpu.dimension_semantics<arbitrary>], iteration_bounds = array<i64: 1, 1, 1>, scalar_prefetch = 0 : i64, scratch_operands = 1 : i64, tpu.core_type = #tpu.core_type<tc>, window_params = [{transform_indices = @transform_0, window_bounds = array<i64: 16, 32>}, {transform_indices = @transform_1, window_bounds = array<i64: 32, 32>}, {transform_indices = @transform_2, window_bounds = array<i64: 1, 32>}, {transform_indices = @transform_3, window_bounds = array<i64: 16, 32>}]} {
    %c0_i32 = arith.constant 0 : i32
    %0 = arith.cmpi eq, %arg2, %c0_i32 : i32
    %1 = arith.extui %0 : i1 to i32
    %c0_i32_0 = arith.constant 0 : i32
    %2 = arith.cmpi ne, %1, %c0_i32_0 : i32
    scf.if %2 {
      %cst_10 = arith.constant 0.000000e+00 : f32
      %12 = vector.broadcast %cst_10 : f32 to vector<16x32xf32>
      %c0_11 = arith.constant 0 : index
      %c0_12 = arith.constant 0 : index
      %13 = vector.load %arg7[%c0_11, %c0_12] : memref<16x32xf32, #tpu.memory_space<vmem>>, vector<16x32xf32>
      tpu.vector_store %arg7[%c0_11, %c0_12], %12 {strides = array<i32>} : memref<16x32xf32, #tpu.memory_space<vmem>>, vector<16x32xf32>,
    } else {
    }
    %c0 = arith.constant 0 : index
    %c0_1 = arith.constant 0 : index
    %3 = vector.load %arg7[%c0, %c0_1] : memref<16x32xf32, #tpu.memory_space<vmem>>, vector<16x32xf32>
    %c0_2 = arith.constant 0 : index
    %c0_3 = arith.constant 0 : index
    %4 = vector.load %arg3[%c0_2, %c0_3] : memref<16x32xbf16, #tpu.memory_space<vmem>>, vector<16x32xbf16>
    %c0_4 = arith.constant 0 : index
    %c0_5 = arith.constant 0 : index
    %5 = vector.load %arg4[%c0_4, %c0_5] : memref<32x32xbf16, #tpu.memory_space<vmem>>, vector<32x32xbf16>
    %cst = arith.constant dense<0.000000e+00> : vector<16x32xf32>
    %6 = tpu.matmul %4, %5, %cst {dimension_numbers = #tpu.dot_dimension_numbers<[1], [0], [0], [1], [0, 0, 1, 1], [], []>} : vector<16x32xbf16>, vector<32x32xbf16>, vector<16x32xf32> -> vector<16x32xf32>
    %7 = arith.addf %3, %6 : vector<16x32xf32>
    %c0_6 = arith.constant 0 : index
    %c0_7 = arith.constant 0 : index
    %8 = vector.load %arg7[%c0_6, %c0_7] : memref<16x32xf32, #tpu.memory_space<vmem>>, vector<16x32xf32>
    tpu.vector_store %arg7[%c0_6, %c0_7], %7 {strides = array<i32>} : memref<16x32xf32, #tpu.memory_space<vmem>>, vector<16x32xf32>,
    %c0_i32_8 = arith.constant 0 : i32
    %9 = arith.cmpi eq, %arg2, %c0_i32_8 : i32
    %10 = arith.extui %9 : i1 to i32
    %c0_i32_9 = arith.constant 0 : i32
    %11 = arith.cmpi ne, %10, %c0_i32_9 : i32
    scf.if %11 {
      %c0_10 = arith.constant 0 : index
      %c0_11 = arith.constant 0 : index
      %12 = vector.load %arg7[%c0_10, %c0_11] : memref<16x32xf32, #tpu.memory_space<vmem>>, vector<16x32xf32>
      %c0_12 = arith.constant 0 : index
      %c0_13 = arith.constant 0 : index
      %13 = vector.load %arg5[%c0_12, %c0_13] : memref<1x32xf32, #tpu.memory_space<vmem>>, vector<1x32xf32>
      %14 = vector.broadcast %13 : vector<1x32xf32> to vector<16x32xf32>
      %15 = arith.addf %12, %14 : vector<16x32xf32>
      %c0_14 = arith.constant 0 : index
      %c0_15 = arith.constant 0 : index
      %16 = vector.load %arg6[%c0_14, %c0_15] : memref<16x32xf32, #tpu.memory_space<vmem>>, vector<16x32xf32>
      tpu.vector_store %arg6[%c0_14, %c0_15], %15 {strides = array<i32>} : memref<16x32xf32, #tpu.memory_space<vmem>>, vector<16x32xf32>,
    } else {
    }
    return
  }
  func.func @transform_0(%arg0: i32, %arg1: i32, %arg2: i32) -> (i32, i32) {
    %c0_i32 = arith.constant 0 : i32
    return %arg0, %arg2 : i32, i32
  }
  func.func @transform_1(%arg0: i32, %arg1: i32, %arg2: i32) -> (i32, i32) {
    %c0_i32 = arith.constant 0 : i32
    return %arg2, %arg1 : i32, i32
  }
  func.func @transform_2(%arg0: i32, %arg1: i32, %arg2: i32) -> (i32, i32) {
    %c0_i32 = arith.constant 0 : i32
    %c0_i32_0 = arith.constant 0 : i32
    return %c0_i32, %arg1 : i32, i32
  }
  func.func @transform_3(%arg0: i32, %arg1: i32, %arg2: i32) -> (i32, i32) {
    %c0_i32 = arith.constant 0 : i32
    return %arg0, %arg1 : i32, i32
  }
}

</mosaic_0001>

<bundles_post_ra>
// kernel: mhatt_forward.5
= control target key start
LH: loop header
LB: loop body
LE: loop exit
PB: predicated region body
PF: predicated region fallthrough
CT: control target
= control target key end

     0   :  { %8 = vsyncpa [#allocation4], 0  ;;  %s401_s0 = inlined_call_operand.hbm [shape: bf16[16,32], index: 0, kind: input, shape index: {}]   ;;  %s402_s1 = inlined_call_operand.hbm [shape: bf16[32,32], index: 1, kind: input, shape index: {}]   ;;  %s403_s2 = inlined_call_operand.hbm [shape: f32[1,32], index: 2, kind: input, shape index: {}]   ;;  %s404_s3 = inlined_call_operand.hbm [shape: bf16[16,32], index: 3, kind: output, shape index: {}]  }
   0x1   :  { %9 = vsyncpa [#allocation7], 0 }
   0x2   :  { %10 = vsyncpa [#allocation5], 0  ;;  %s304_s12 = smov [#allocation6]   ;;  %s305_s14 = smov [#allocation3]  }
   0x3   :  { %s28_s13 = sshll.u32 %s304_s12, 4  ;;  %s16_s15 = sshll.u32 %s305_s14, 4  ;;  %s29_s13 = int_to_ptr.vmem [resolvable:$true] %s28_s13  ;;  %s332_s15 = int_to_ptr.vmem [resolvable:$true] %s16_s15 }
   0x4   :  { %s210_s18 = scalar_lea.hbm %s402_s1, 256 }
   0x5   :  { %p211_p0 = scmp.ne.s32.totalorder %s402_s1, %s210_s18  ;;  %p214_p1 = scmp.lt.u32.totalorder %s210_s18, %s402_s1 }
   0x7   :  { %p216_p2 = pnand %p214_p1, %p211_p0 }
   0x9   :  { %219 = shalt.err (!%p216_p2)
}
   0xa   :  { %s220_s23 = scalar_lea.vmem %s29_s13, 256  ;;  %p225_p4 = scmp.lt.s32.totalorder %s29_s13, %s29_s13 }
   0xb   :  { %p221_p3 = scmp.ne.s32.totalorder %s29_s13, %s220_s23  ;;  %p226_p5 = scmp.lt.s32.totalorder %s220_s23, %s220_s23 }
   0xd   :  { %p227_p6 = por %p226_p5, %p225_p4 }
   0xf   :  { %p228_p7 = pnand %p227_p6, %p221_p3 }
  0x11   :  { %231 = shalt.err (!%p228_p7)
}
  0x12   :  { %s306_s24 = smov 64   ;;  %s307_s25 = smov 4  }
  0x13   :  { %34 = dma.hbm_to_vmem [thread:$0]  %s402_s1, 256, %s29_s13, [#allocation7], %s306_s24, %s306_s24, %s307_s25  }
  0x14   :  { %s232_s30 = scalar_lea.hbm %s401_s0, 128 }
  0x15   :  { %p233_p8 = scmp.ne.s32.totalorder %s401_s0, %s232_s30  ;;  %p236_p9 = scmp.lt.u32.totalorder %s232_s30, %s401_s0 }
  0x17   :  { %p238_p10 = pnand %p236_p9, %p233_p8 }
  0x19   :  { %241 = shalt.err (!%p238_p10)
}
  0x1a   :  { %s242_s8 = scalar_lea.vmem %s332_s15, 128  ;;  %p247_p12 = scmp.lt.s32.totalorder %s332_s15, %s332_s15 }
  0x1b   :  { %p243_p11 = scmp.ne.s32.totalorder %s332_s15, %s242_s8  ;;  %p248_p13 = scmp.lt.s32.totalorder %s242_s8, %s242_s8 }
  0x1d   :  { %p249_p0 = por %p248_p13, %p247_p12 }
  0x1f   :  { %p250_p1 = pnand %p249_p0, %p243_p11 }
  0x21   :  { %253 = shalt.err (!%p250_p1)
}
  0x22   :  { %22 = dma.hbm_to_vmem [thread:$0]  %s401_s0, 128, %s332_s15, [#allocation4], %s306_s24, %s306_s24, %s307_s25  }
  0x23   :  { %s308_s10 = smov [#allocation8]   ;;  %s254_s14 = scalar_lea.hbm %s403_s2, 16 }
  0x24   :  { %s41_s11 = sshll.u32 %s308_s10, 4  ;;  %p255_p2 = scmp.ne.s32.totalorder %s403_s2, %s254_s14  ;;  %s42_s11 = int_to_ptr.vmem [resolvable:$true] %s41_s11 }
  0x25   :  { %p258_p3 = scmp.lt.u32.totalorder %s254_s14, %s403_s2 }
  0x27   :  { %p260_p4 = pnand %p258_p3, %p255_p2 }
  0x29   :  { %263 = shalt.err (!%p260_p4)
}
  0x2a   :  { %s264_s20 = scalar_lea.vmem %s42_s11, 16  ;;  %s268_s0 = scalar_lea.vmem %s42_s11, 32 }
  0x2b   :  { %p265_p5 = scmp.ne.s32.totalorder %s42_s11, %s264_s20  ;;  %p269_p6 = scmp.lt.s32.totalorder %s42_s11, %s42_s11 }
  0x2c   :  { %p270_p7 = scmp.lt.s32.totalorder %s268_s0, %s264_s20 }
  0x2e   :  { %p271_p8 = por %p270_p7, %p269_p6 }
  0x30   :  { %p272_p9 = pnand %p271_p8, %p265_p5 }
  0x32   :  { %275 = shalt.err (!%p272_p9)
}
  0x33   :  { %44 = dma.hbm_to_vmem [thread:$0]  %s403_s2, 16, %s42_s11, [#allocation7]  }
  0x34   :  { %298 = dma.done.wait [#allocation4], 128  }
  0x35   :  { %299 = vsyncadd [#allocation4], 4294967168 }
  0x36   :  { %300 = dma.done.wait [#allocation7], 272  }
  0x37   :  { %301 = vsyncadd [#allocation7], 4294967024  ;;  %vm59_vm0 = vcmask 261120   ;;  %v309_v0 = vmov 0.0   ;;  %vm310_vm1 = vmmov 0   ;;  %v207_v1 = vld [vmem:[#allocation6] sm:$0xff]  }
  0x38   :  { %191 = vmatprep.subr.bf16.mxu0 %v309_v0  ;;  %195 = vmatprep.mubr.msk.bf16.mxu0 %vm310_vm1, %v309_v0  ;;  %60 = vst.msk [vmem:[#allocation2] sm:$0xff] %vm59_vm0, %v309_v0  ;;  %61 = vst.msk [vmem:[#allocation2 + $0x8] sm:$0xff] %vm59_vm0, %v309_v0  ;;  %v208_v2 = vld [vmem:[#allocation6 + $0x8] sm:$0xff]   ;;  %v209_v3 = vld [vmem:[#allocation3] sm:$0xff]   ;;  %vm158_vm2 = vcmask 257024   ;;  %s311_s2 = smov [#allocation9]  }
  0x39   :  { %192 = vmatpush3.bf16.msra.mxu0 %v207_v1  ;;  %v183_v12 = vld [vmem:[#allocation8] ss:$0 sm:$0xff]  ;;  %s166_s22 = sshll.u32 %s311_s2, 4  ;;  %s167_s22 = int_to_ptr.vmem [resolvable:$true] %s166_s22 }
  0x3a   :  { %193 = vmatprep.subr.bf16.mxu0 %v309_v0  ;;  %s276_s23 = scalar_lea.vmem %s167_s22, 128  ;;  %p281_p11 = scmp.lt.s32.totalorder %s167_s22, %s167_s22 }
  0x3b   :  { %p277_p10 = scmp.ne.s32.totalorder %s167_s22, %s276_s23  ;;  %p282_p12 = scmp.lt.s32.totalorder %s276_s23, %s276_s23 }
  0x3d   :  { %194 = vmatpush3.bf16.msra.mxu0 %v208_v2  ;;  %p283_p13 = por %p282_p12, %p281_p11 }
  0x3f   :  { %v62_v4 = vld [vmem:[#allocation2] sm:$0xff]  ;;  %v63_v6 = vld [vmem:[#allocation2 + $0x8] sm:$0xff]  ;;  %p284_p0 = pnand %p283_p13, %p277_p10 }
  0x40   :  { %196 = vmatmul.mubr.msk.bf16.vlgmr.msra.gmra.mrb[0].mxu0 %vm59_vm0, %v209_v3 }
 0x113   :  { %v125_v5 = vpop.f32.mrb[0].mxu0 }
 0x114   :  { %v132_v7 = vadd.f32 %v125_v5, %v62_v4  ;;  %v197_v8 = vpop.f32.mrb[1].mxu0 }
 0x115   :  { %v128_v9 = vpop.f32.mrb[2].mxu0 }
 0x116   :  { %134 = vst.msk [vmem:[#allocation2] sm:$0xff] %vm59_vm0, %v132_v7  ;;  %v133_v10 = vadd.f32 %v128_v9, %v63_v6  ;;  %v198_v11 = vpop.f32.mrb[3].mxu0 }
 0x118   :  { %135 = vst.msk [vmem:[#allocation2 + $0x8] sm:$0xff] %vm59_vm0, %v133_v10 }
 0x11d   :  { %v139_v13 = vld [vmem:[#allocation2] sm:$0xff] }
 0x11e   :  { %v148_v14 = vadd.f32 %v183_v12, %v139_v13 }
 0x11f   :  { %v140_v15 = vld [vmem:[#allocation2 + $0x8] sm:$0xff] }
 0x120   :  { %v149_v16 = vadd.f32 %v183_v12, %v140_v15  ;;  %v186_v17 = vpack.c.bf16 %v148_v14, %v148_v14 }
 0x122   :  { %v187_v18 = vpack.c.bf16 %v149_v16, %v149_v16  ;;  %159 = vst.msk [vmem:[#allocation9] sm:$0xf] %vm158_vm2, %v186_v17 }
 0x124   :  { %160 = vst.msk [vmem:[#allocation9 + $0x4] sm:$0xf] %vm158_vm2, %v187_v18 }
 0x125   :  { %287 = shalt.err (!%p284_p0)
}
 0x126   :  { %s288_s28 = scalar_lea.hbm %s404_s3, 128 }
 0x127   :  { %p289_p1 = scmp.ne.s32.totalorder %s404_s3, %s288_s28  ;;  %p292_p2 = scmp.lt.u32.totalorder %s288_s28, %s404_s3 }
 0x129   :  { %p294_p3 = pnand %p292_p2, %p289_p1 }
 0x12b   :  { %297 = shalt.err (!%p294_p3)
}
 0x12c   :  { %172 = dma.vmem_to_hbm [thread:$0]  %s167_s22, 128, %s404_s3, [#allocation5], %s306_s24, %s306_s24, %s307_s25  }
 0x12d   :  { %302 = dma.done.wait [#allocation5], 128  }
 0x12e   :  { %303 = vsyncadd [#allocation5], 4294967168 }
 0x12f   :  { %176 = vsyncpa [#allocation4], 1 }
 0x130   :  { %177 = vsyncpa [#allocation7], 1 }
 0x131   :  { %178 = vsyncpa [#allocation5], 1 }

// kernel: mhatt_forward.9
= control target key start
LH: loop header
LB: loop body
LE: loop exit
PB: predicated region body
PF: predicated region fallthrough
CT: control target
= control target key end

     0   :  { %8 = vsyncpa [#allocation4], 0  ;;  %s385_s0 = inlined_call_operand.hbm [shape: bf16[16,32], index: 0, kind: input, shape index: {}]   ;;  %s386_s1 = inlined_call_operand.hbm [shape: bf16[32,32], index: 1, kind: input, shape index: {}]   ;;  %s387_s2 = inlined_call_operand.hbm [shape: f32[1,32], index: 2, kind: input, shape index: {}]   ;;  %s388_s3 = inlined_call_operand.hbm [shape: f32[16,32], index: 3, kind: output, shape index: {}]  }
   0x1   :  { %9 = vsyncpa [#allocation7], 0 }
   0x2   :  { %10 = vsyncpa [#allocation5], 0  ;;  %s293_s12 = smov [#allocation6]   ;;  %s294_s14 = smov [#allocation3]  }
   0x3   :  { %s28_s13 = sshll.u32 %s293_s12, 4  ;;  %s16_s15 = sshll.u32 %s294_s14, 4  ;;  %s29_s13 = int_to_ptr.vmem [resolvable:$true] %s28_s13  ;;  %s323_s15 = int_to_ptr.vmem [resolvable:$true] %s16_s15 }
   0x4   :  { %s199_s18 = scalar_lea.hbm %s386_s1, 256 }
   0x5   :  { %p200_p0 = scmp.ne.s32.totalorder %s386_s1, %s199_s18  ;;  %p203_p1 = scmp.lt.u32.totalorder %s199_s18, %s386_s1 }
   0x7   :  { %p205_p2 = pnand %p203_p1, %p200_p0 }
   0x9   :  { %208 = shalt.err (!%p205_p2)
}
   0xa   :  { %s209_s23 = scalar_lea.vmem %s29_s13, 256  ;;  %p214_p4 = scmp.lt.s32.totalorder %s29_s13, %s29_s13 }
   0xb   :  { %p210_p3 = scmp.ne.s32.totalorder %s29_s13, %s209_s23  ;;  %p215_p5 = scmp.lt.s32.totalorder %s209_s23, %s209_s23 }
   0xd   :  { %p216_p6 = por %p215_p5, %p214_p4 }
   0xf   :  { %p217_p7 = pnand %p216_p6, %p210_p3 }
  0x11   :  { %220 = shalt.err (!%p217_p7)
}
  0x12   :  { %s295_s24 = smov 64   ;;  %s296_s25 = smov 4  }
  0x13   :  { %34 = dma.hbm_to_vmem [thread:$0]  %s386_s1, 256, %s29_s13, [#allocation7], %s295_s24, %s295_s24, %s296_s25  }
  0x14   :  { %s221_s30 = scalar_lea.hbm %s385_s0, 128 }
  0x15   :  { %p222_p8 = scmp.ne.s32.totalorder %s385_s0, %s221_s30  ;;  %p225_p9 = scmp.lt.u32.totalorder %s221_s30, %s385_s0 }
  0x17   :  { %p227_p10 = pnand %p225_p9, %p222_p8 }
  0x19   :  { %230 = shalt.err (!%p227_p10)
}
  0x1a   :  { %s231_s8 = scalar_lea.vmem %s323_s15, 128  ;;  %p236_p12 = scmp.lt.s32.totalorder %s323_s15, %s323_s15 }
  0x1b   :  { %p232_p11 = scmp.ne.s32.totalorder %s323_s15, %s231_s8  ;;  %p237_p13 = scmp.lt.s32.totalorder %s231_s8, %s231_s8 }
  0x1d   :  { %p238_p0 = por %p237_p13, %p236_p12 }
  0x1f   :  { %p239_p1 = pnand %p238_p0, %p232_p11 }
  0x21   :  { %242 = shalt.err (!%p239_p1)
}
  0x22   :  { %22 = dma.hbm_to_vmem [thread:$0]  %s385_s0, 128, %s323_s15, [#allocation4], %s295_s24, %s295_s24, %s296_s25  }
  0x23   :  { %s297_s10 = smov [#allocation8]   ;;  %s243_s14 = scalar_lea.hbm %s387_s2, 16 }
  0x24   :  { %s41_s11 = sshll.u32 %s297_s10, 4  ;;  %p244_p2 = scmp.ne.s32.totalorder %s387_s2, %s243_s14  ;;  %s42_s11 = int_to_ptr.vmem [resolvable:$true] %s41_s11 }
  0x25   :  { %p247_p3 = scmp.lt.u32.totalorder %s243_s14, %s387_s2 }
  0x27   :  { %p249_p4 = pnand %p247_p3, %p244_p2 }
  0x29   :  { %252 = shalt.err (!%p249_p4)
}
  0x2a   :  { %s253_s20 = scalar_lea.vmem %s42_s11, 16  ;;  %s257_s0 = scalar_lea.vmem %s42_s11, 32 }
  0x2b   :  { %p254_p5 = scmp.ne.s32.totalorder %s42_s11, %s253_s20  ;;  %p258_p6 = scmp.lt.s32.totalorder %s42_s11, %s42_s11 }
  0x2c   :  { %p259_p7 = scmp.lt.s32.totalorder %s257_s0, %s253_s20 }
  0x2e   :  { %p260_p8 = por %p259_p7, %p258_p6 }
  0x30   :  { %p261_p9 = pnand %p260_p8, %p254_p5 }
  0x32   :  { %264 = shalt.err (!%p261_p9)
}
  0x33   :  { %44 = dma.hbm_to_vmem [thread:$0]  %s387_s2, 16, %s42_s11, [#allocation7]  }
  0x34   :  { %287 = dma.done.wait [#allocation4], 128  }
  0x35   :  { %288 = vsyncadd [#allocation4], 4294967168 }
  0x36   :  { %289 = dma.done.wait [#allocation7], 272  }
  0x37   :  { %290 = vsyncadd [#allocation7], 4294967024  ;;  %vm59_vm0 = vcmask 261120   ;;  %v298_v0 = vmov 0.0   ;;  %vm299_vm1 = vmmov 0   ;;  %v196_v1 = vld [vmem:[#allocation6] sm:$0xff]  }
  0x38   :  { %178 = vmatprep.subr.bf16.mxu0 %v298_v0  ;;  %182 = vmatprep.mubr.msk.bf16.mxu0 %vm299_vm1, %v298_v0  ;;  %60 = vst.msk [vmem:[#allocation2] sm:$0xff] %vm59_vm0, %v298_v0  ;;  %61 = vst.msk [vmem:[#allocation2 + $0x8] sm:$0xff] %vm59_vm0, %v298_v0  ;;  %v197_v2 = vld [vmem:[#allocation6 + $0x8] sm:$0xff]   ;;  %v198_v3 = vld [vmem:[#allocation3] sm:$0xff]   ;;  %s300_s2 = smov [#allocation9]  }
  0x39   :  { %179 = vmatpush3.bf16.msra.mxu0 %v196_v1  ;;  %v174_v12 = vld [vmem:[#allocation8] ss:$0 sm:$0xff]  ;;  %s157_s22 = sshll.u32 %s300_s2, 4  ;;  %s158_s22 = int_to_ptr.vmem [resolvable:$true] %s157_s22 }
  0x3a   :  { %180 = vmatprep.subr.bf16.mxu0 %v298_v0  ;;  %s265_s23 = scalar_lea.vmem %s158_s22, 256  ;;  %p270_p11 = scmp.lt.s32.totalorder %s158_s22, %s158_s22 }
  0x3b   :  { %p266_p10 = scmp.ne.s32.totalorder %s158_s22, %s265_s23  ;;  %p271_p12 = scmp.lt.s32.totalorder %s265_s23, %s265_s23 }
  0x3d   :  { %181 = vmatpush3.bf16.msra.mxu0 %v197_v2  ;;  %p272_p13 = por %p271_p12, %p270_p11 }
  0x3f   :  { %v62_v4 = vld [vmem:[#allocation2] sm:$0xff]  ;;  %v63_v6 = vld [vmem:[#allocation2 + $0x8] sm:$0xff]  ;;  %p273_p0 = pnand %p272_p13, %p266_p10 }
  0x40   :  { %183 = vmatmul.mubr.msk.bf16.vlgmr.msra.gmra.mrb[0].mxu0 %vm59_vm0, %v198_v3 }
 0x113   :  { %v125_v5 = vpop.f32.mrb[0].mxu0 }
 0x114   :  { %v132_v7 = vadd.f32 %v125_v5, %v62_v4  ;;  %v184_v8 = vpop.f32.mrb[1].mxu0 }
 0x115   :  { %v128_v9 = vpop.f32.mrb[2].mxu0 }
 0x116   :  { %134 = vst.msk [vmem:[#allocation2] sm:$0xff] %vm59_vm0, %v132_v7  ;;  %v133_v10 = vadd.f32 %v128_v9, %v63_v6  ;;  %v185_v11 = vpop.f32.mrb[3].mxu0 }
 0x118   :  { %135 = vst.msk [vmem:[#allocation2 + $0x8] sm:$0xff] %vm59_vm0, %v133_v10 }
 0x11d   :  { %v139_v13 = vld [vmem:[#allocation2] sm:$0xff] }
 0x11e   :  { %v148_v14 = vadd.f32 %v174_v12, %v139_v13 }
 0x11f   :  { %v140_v15 = vld [vmem:[#allocation2 + $0x8] sm:$0xff] }
 0x120   :  { %v149_v16 = vadd.f32 %v174_v12, %v140_v15  ;;  %150 = vst.msk [vmem:[#allocation9] sm:$0xff] %vm59_vm0, %v148_v14 }
 0x122   :  { %151 = vst.msk [vmem:[#allocation9 + $0x8] sm:$0xff] %vm59_vm0, %v149_v16 }
 0x123   :  { %276 = shalt.err (!%p273_p0)
}
 0x124   :  { %s277_s26 = scalar_lea.hbm %s388_s3, 256 }
 0x125   :  { %p278_p1 = scmp.ne.s32.totalorder %s388_s3, %s277_s26  ;;  %p281_p2 = scmp.lt.u32.totalorder %s277_s26, %s388_s3 }
 0x127   :  { %p283_p3 = pnand %p281_p2, %p278_p1 }
 0x129   :  { %286 = shalt.err (!%p283_p3)
}
 0x12a   :  { %s301_s4 = smov 128   ;;  %s302_s5 = smov 8  }
 0x12b   :  { %163 = dma.vmem_to_hbm [thread:$0]  %s158_s22, 256, %s388_s3, [#allocation5], %s301_s4, %s301_s4, %s302_s5  }
 0x12c   :  { %291 = dma.done.wait [#allocation5], 256  }
 0x12d   :  { %292 = vsyncadd [#allocation5], 4294967040 }
 0x12e   :  { %167 = vsyncpa [#allocation4], 1 }
 0x12f   :  { %168 = vsyncpa [#allocation7], 1 }
 0x130   :  { %169 = vsyncpa [#allocation5], 1 }

// kernel: mhatt_forward.8
= control target key start
LH: loop header
LB: loop body
LE: loop exit
PB: predicated region body
PF: predicated region fallthrough
CT: control target
= control target key end

     0   :  { %s2008_s0 = inlined_call_operand.hbm [shape: bf16[2,8,32], index: 0, kind: input, shape index: {}]   ;;  %s2009_s1 = inlined_call_operand.hbm [shape: bf16[2,8,32], index: 1, kind: input, shape index: {}]   ;;  %s2010_s2 = inlined_call_operand.hbm [shape: bf16[2,8,32], index: 2, kind: input, shape index: {}]   ;;  %s2011_s3 = inlined_call_operand.hbm [shape: f32[2,1,1,8], index: 3, kind: input, shape index: {}]   ;;  %s2012_s4 = inlined_call_operand.hbm [shape: f32[2,4,8,8], index: 4, kind: output, shape index: {0}]   ;;  %s2013_s5 = inlined_call_operand.hbm [shape: bf16[2,8,32], index: 5, kind: output, shape index: {1}]  }
   0x1   :  { %2024 = sst [smem:[#allocation24_spill]] %s2009_s1 }
   0x2   :  { %11 = vsyncpa [#allocation3], 0 }
   0x3   :  { %13 = vsyncpa [#allocation3 + $0x1], 0 }
   0x4   :  { %14 = vsyncpa [#allocation6], 0 }
   0x5   :  { %16 = vsyncpa [#allocation6 + $0x1], 0 }
   0x6   :  { %17 = vsyncpa [#allocation9], 0 }
   0x7   :  { %19 = vsyncpa [#allocation9 + $0x1], 0 }
   0x8   :  { %20 = vsyncpa [#allocation4], 0 }
   0x9   :  { %22 = vsyncpa [#allocation4 + $0x1], 0 }
   0xa   :  { %23 = vsyncpa [#allocation12], 0 }
   0xb   :  { %25 = vsyncpa [#allocation12 + $0x1], 0  ;;  %s1590_s18 = smov 0   ;;  %s1592_s19 = smov 0  }
   0xc   :  { %s1594_s20 = smov 0   ;;  %s1596_s21 = smov 0  }
   0xd   :  { %s1598_s22 = smov 0   ;;  %s1600_s23 = smov 0  }
   0xe LB: > { %2025 = sst [smem:[#allocation18_spill]] %s1523_s18  ;;  %s1621_s24 = sadd.s32 4294967295, %s1543_s23   ;;  %s1543_s23 = sphi %s1600_s23, %s31_s23   ;;  %s1539_s22 = sphi %s1598_s22, %s2057_s22   ;;  %s1535_s21 = sphi %s1596_s21, %s2056_s21   ;;  %s1531_s20 = sphi %s1594_s20, %s2052_s20   ;;  %s1527_s19 = sphi %s1592_s19, %s2055_s19   ;;  %s1523_s18 = sphi %s1590_s18, %s2054_s18  }
   0xf   : > { %2026 = sst [smem:[#allocation19_spill]] %s1531_s20  ;;  %s1083_s25 = sadd.s32 4294967294, %s1543_s23  }
  0x10   : > { %2027 = sst [smem:[#allocation20_spill]] %s1543_s23  ;;  %s43_s26 = sadd.s32 1, %s1539_s22 }
  0x11   : > { %s52_s27 = sadd.s32 1, %s1531_s20  ;;  %p45_p0 = scmp.ge.s32.totalorder %s43_s26, 2 }
  0x12   : > { %p59_p1 = scmp.ne.s32.totalorder %s1531_s20, %s1527_s19  ;;  %p60_p2 = scmp.eq.s32.totalorder %s1543_s23, 0 }
  0x13   : > { %p65_p3 = scmp.ne.s32.totalorder %s1527_s19, %s1523_s18  ;;  %s2059_s26 = smov (%p45_p0, %s43_s26), 0 }
  0x14   : > { %2028 = sst [smem:[#allocation21_spill]] %s2059_s26  ;;  %p1633_p4 = por %p60_p2, %p59_p1 }
  0x15   : > { %p66_p5 = scmp.eq.s32.totalorder %s1621_s24, 0  ;;  %s47_s29 = ssub.s32 %s1539_s22, %s2059_s26 }
  0x16   : > { %p169_p6 = scmp.eq.s32.totalorder %s1621_s24, 1  ;;  %p50_p7 = scmp.eq.s32.totalorder %s47_s29, 0 }
  0x17   : > { %p1641_p8 = por %p66_p5, %p65_p3  ;;  %p175_p10 = scmp.eq.s32.totalorder %s1083_s25, 1 }
  0x18   : > { %p1645_p9 = por %p169_p6, %p59_p1  ;;  %p1224_p13 = scmp.lt.s32.totalorder %s1543_s23, 2 }
  0x19   : > { %s2030_s30 = scalar_select %p1641_p8, 1, 0 }
  0x1a   : > { %s2031_s6 = scalar_select %p1645_p9, 1, 0 }
  0x1b   : > { %s1650_s7 = scalar_select %p50_p7, %s1531_s20, %s52_s27  }
  0x1c   : > { %p1652_p11 = por %p175_p10, %p65_p3  ;;  %s1659_s9 = sand.u32 1, %s1531_s20  }
  0x1d   : > { %2032 = sst [smem:[#allocation22_spill]] %s1650_s7  ;;  %s1662_s10 = sshll.u32 %s1659_s9, 2 }
  0x1e   : > { %s2033_s8 = scalar_select %p1652_p11, 1, 0 }
  0x1f   : > { %s1665_s11 = sshll.u32 %s1539_s22, 6  ;;  %p1669_p0 = pnand %p1224_p13, %p1633_p4 }
  0x20   : > { %2034 = sst [smem:[#allocation23_spill]] %s2033_s8  ;;  %s242_s13 = sand.u32 1, %s1543_s23  }
  0x21   : > { %s2035_s12 = scalar_select %p1669_p0, 1, 0 }
  0x22   : > { %s2036_s1 = sld [smem:[#allocation24_spill]]  ;;  %s246_s17 = scalar_lea.vmem [#allocation5], %s1662_s10 }
  0x23   : > { %s253_s25 = sshll.u32 %s246_s17, 4  ;;  %s1685_s27 = scalar_lea.sflag [#allocation6], %s242_s13  ;;  %s1682_s25 = int_to_ptr.vmem [resolvable:$true] %s253_s25 }
  0x24   : > { %p1691_p4 = pneg %p1669_p0 }
  0x28   : > { %s1678_s16 = scalar_lea.hbm %s2036_s1, %s1665_s11  ;;  %s1306_s17 = scalar_lea.hbm %s2036_s1, 128 }
  0x29   : > { %s1301_s28 = scalar_lea.hbm %s1678_s16, 64  ;;  %p1307_p7 = scmp.lt.u32.totalorder %s1678_s16, %s2036_s1 }
  0x2a   : > { %p1302_p3 = scmp.ne.s32.totalorder %s1678_s16, %s1301_s28  ;;  %p1308_p10 = scmp.lt.u32.totalorder %s1306_s17, %s1301_s28 }
  0x2b   : > { %p1310_p12 = scmp.lt.u32.totalorder %s1301_s28, %s1678_s16 }
  0x2c   : > { %p1304_p5 = pnand %p1691_p4, %p1302_p3  ;;  %p1309_p13 = por %p1308_p10, %p1307_p7 }
  0x2e   : > { %p1305_p6 = pneg %p1304_p5  ;;  %p1311_p1 = por %p1310_p12, %p1309_p13 }
  0x30   : > { %p1312_p2 = pnand %p1311_p1, %p1305_p6 }
  0x32   : > { %1315 = shalt.err (!%p1312_p2)
}
  0x33   : > { %s1316_s13 = scalar_lea.vmem %s1682_s25, 64  ;;  %s1545_s14 = smov [#allocation5]  }
  0x34   : > { %p1317_p3 = scmp.ne.s32.totalorder %s1682_s25, %s1316_s13  ;;  %s1321_s15 = sshll.u32 %s1545_s14, 4  ;;  %s1322_s15 = int_to_ptr.vmem [resolvable:$false] %s1321_s15 }
  0x35   : > { %s1323_s26 = scalar_lea.vmem %s1322_s15, 128  ;;  %p1324_p9 = scmp.lt.s32.totalorder %s1682_s25, %s1322_s15 }
  0x36   : > { %p1319_p5 = pnand %p1317_p3, %p1691_p4  ;;  %p1325_p8 = scmp.lt.s32.totalorder %s1323_s26, %s1316_s13 }
  0x38   : > { %p1320_p11 = pneg %p1319_p5  ;;  %p1326_p7 = por %p1325_p8, %p1324_p9 }
  0x3a   : > { %p1327_p10 = pnand %p1326_p7, %p1320_p11 }
  0x3c   : > { %1330 = shalt.err (!%p1327_p10)
}
  0x3d   : > { %1210 = dma.hbm_to_vmem [thread:$0]  (!%p1669_p0), %s1678_s16, 64, %s1682_s25, %s1685_s27  }
  0x3e   : > { %p2038_p12 = scmp.lt.s32.totalorder %s1543_s23, 3  ;;  %p2039_p1 = scmp.ge.s32.totalorder %s1543_s23, 1 }
  0x3f   : > { %s1727_s13 = scalar_lea.hbm %s2008_s0, %s1665_s11  ;;  %s227_s14 = scalar_lea.vmem [#allocation2], %s1662_s10 }
  0x40   : > { %p1719_p2 = pnand %p2039_p1, %p2038_p12  ;;  %s235_s15 = sshll.u32 %s227_s14, 4  ;;  %s1730_s15 = int_to_ptr.vmem [resolvable:$true] %s235_s15 }
  0x41   : > { %s1736_s26 = scalar_lea.hbm %s2010_s2, %s1665_s11  ;;  %s224_s1 = scalar_lea.sflag [#allocation3], %s1659_s9 }
  0x42   : > { %s2040_s7 = scalar_select %p1719_p2, 1, 0 }
  0x43   : > { %s1331_s20 = scalar_lea.hbm %s1727_s13, 64  ;;  %s1336_s23 = scalar_lea.hbm %s2008_s0, 128 }
  0x44   : > { %p1332_p8 = scmp.ne.s32.totalorder %s1727_s13, %s1331_s20  ;;  %p1337_p6 = scmp.lt.u32.totalorder %s1727_s13, %s2008_s0 }
  0x45   : > { %p1338_p13 = scmp.lt.u32.totalorder %s1336_s23, %s1331_s20  ;;  %p1340_p5 = scmp.lt.u32.totalorder %s1331_s20, %s1727_s13 }
  0x46   : > { %p1334_p9 = pnand %p1332_p8, %p1691_p4 }
  0x47   : > { %p1339_p3 = por %p1338_p13, %p1337_p6 }
  0x48   : > { %p1335_p11 = pneg %p1334_p9 }
  0x49   : > { %p1341_p7 = por %p1340_p5, %p1339_p3 }
  0x4b   : > { %p1342_p10 = pnand %p1341_p7, %p1335_p11 }
  0x4d   : > { %1345 = shalt.err (!%p1342_p10)
}
  0x4e   : > { %s1346_s11 = scalar_lea.vmem %s1730_s15, 64  ;;  %s1546_s14 = smov [#allocation2]  }
  0x4f   : > { %p1347_p12 = scmp.ne.s32.totalorder %s1730_s15, %s1346_s11  ;;  %s1351_s16 = sshll.u32 %s1546_s14, 4  ;;  %s1352_s16 = int_to_ptr.vmem [resolvable:$false] %s1351_s16 }
  0x50   : > { %s1353_s18 = scalar_lea.vmem %s1352_s16, 128  ;;  %p1354_p9 = scmp.lt.s32.totalorder %s1730_s15, %s1352_s16 }
  0x51   : > { %p1349_p1 = pnand %p1347_p12, %p1691_p4  ;;  %p1355_p2 = scmp.lt.s32.totalorder %s1353_s18, %s1346_s11 }
  0x53   : > { %p1350_p8 = pneg %p1349_p1  ;;  %p1356_p6 = por %p1355_p2, %p1354_p9 }
  0x55   : > { %p1357_p13 = pnand %p1356_p6, %p1350_p8 }
  0x57   : > { %1360 = shalt.err (!%p1357_p13)
}
  0x58   : > { %1207 = dma.hbm_to_vmem [thread:$0]  (!%p1669_p0), %s1727_s13, 64, %s1730_s15, %s224_s1  }
  0x59   : > { %s264_s20 = scalar_lea.vmem [#allocation7], %s1662_s10  ;;  %s1361_s8 = scalar_lea.hbm %s1736_s26, 64 }
  0x5a   : > { %s271_s23 = sshll.u32 %s264_s20, 4  ;;  %p1362_p11 = scmp.ne.s32.totalorder %s1736_s26, %s1361_s8  ;;  %s272_s23 = int_to_ptr.vmem [resolvable:$true] %s271_s23 }
  0x5b   : > { %s1366_s17 = scalar_lea.hbm %s2010_s2, 128  ;;  %p1367_p5 = scmp.lt.u32.totalorder %s1736_s26, %s2010_s2 }
  0x5c   : > { %p1364_p2 = pnand %p1362_p11, %p1691_p4  ;;  %p1368_p7 = scmp.lt.u32.totalorder %s1366_s17, %s1361_s8 }
  0x5d   : > { %p1370_p12 = scmp.lt.u32.totalorder %s1361_s8, %s1736_s26 }
  0x5e   : > { %p1365_p3 = pneg %p1364_p2  ;;  %p1369_p10 = por %p1368_p7, %p1367_p5 }
  0x60   : > { %p1371_p1 = por %p1370_p12, %p1369_p10 }
  0x62   : > { %p1372_p8 = pnand %p1371_p1, %p1365_p3 }
  0x64   : > { %1375 = shalt.err (!%p1372_p8)
}
  0x65   : > { %s1376_s1 = scalar_lea.vmem %s272_s23, 64  ;;  %s1547_s10 = smov [#allocation7]  }
  0x66   : > { %p1377_p9 = scmp.ne.s32.totalorder %s272_s23, %s1376_s1  ;;  %s1381_s13 = sshll.u32 %s1547_s10, 4  ;;  %s1382_s13 = int_to_ptr.vmem [resolvable:$false] %s1381_s13 }
  0x67   : > { %s1383_s15 = scalar_lea.vmem %s1382_s13, 128  ;;  %p1384_p11 = scmp.lt.s32.totalorder %s272_s23, %s1382_s13 }
  0x68   : > { %p1379_p6 = pnand %p1377_p9, %p1691_p4  ;;  %p1385_p2 = scmp.lt.s32.totalorder %s1383_s15, %s1376_s1 }
  0x6a   : > { %p1380_p13 = pneg %p1379_p6  ;;  %p1386_p0 = por %p1385_p2, %p1384_p11 }
  0x6c   : > { %p1387_p5 = pnand %p1386_p0, %p1380_p13 }
  0x6e   : > { %1390 = shalt.err (!%p1387_p5)
}
  0x6f   : > { %p2041_p7 = scmp.ne.s32.totalorder %s2035_s12, 0  ;;  %s1092_s16 = sshll.u32 %s1539_s22, 4 }
  0x70   : > { %s281_s18 = scalar_lea.vmem [#allocation8], %s1659_s9  ;;  %s1784_s28 = scalar_lea.hbm %s2011_s3, %s1092_s16 }
  0x71   : > { %1213 = dma.hbm_to_vmem [thread:$0]  (!%p2041_p7), %s1736_s26, 64, %s272_s23, %s1685_s27  }
  0x72   : > { %s288_s20 = sshll.u32 %s281_s18, 4  ;;  %s279_s17 = scalar_lea.sflag [#allocation9], %s1659_s9  ;;  %s289_s20 = int_to_ptr.vmem [resolvable:$true] %s288_s20 }
  0x73   : > { %s1391_s11 = scalar_lea.hbm %s1784_s28, 16  ;;  %s1396_s23 = scalar_lea.hbm %s2011_s3, 32 }
  0x74   : > { %p1392_p0 = scmp.ne.s32.totalorder %s1784_s28, %s1391_s11  ;;  %p1397_p12 = scmp.lt.u32.totalorder %s1784_s28, %s2011_s3 }
  0x75   : > { %p1398_p1 = scmp.lt.u32.totalorder %s1396_s23, %s1391_s11  ;;  %p1400_p9 = scmp.lt.u32.totalorder %s1391_s11, %s1784_s28 }
  0x76   : > { %p1394_p3 = pnand %p1392_p0, %p1691_p4 }
  0x77   : > { %p1399_p8 = por %p1398_p1, %p1397_p12 }
  0x78   : > { %p1395_p10 = pneg %p1394_p3 }
  0x79   : > { %p1401_p6 = por %p1400_p9, %p1399_p8 }
  0x7b   : > { %p1402_p13 = pnand %p1401_p6, %p1395_p10 }
  0x7d   : > { %1405 = shalt.err (!%p1402_p13)
}
  0x7e   : > { %s1406_s9 = scalar_lea.vmem %s289_s20, 16  ;;  %s1548_s10 = smov [#allocation8]  }
  0x7f   : > { %p1407_p11 = scmp.ne.s32.totalorder %s289_s20, %s1406_s9  ;;  %s1411_s13 = sshll.u32 %s1548_s10, 4  ;;  %s1412_s13 = int_to_ptr.vmem [resolvable:$false] %s1411_s13 }
  0x80   : > { %s1413_s15 = scalar_lea.vmem %s1412_s13, 32  ;;  %p1414_p0 = scmp.lt.s32.totalorder %s289_s20, %s1412_s13 }
  0x81   : > { %p1409_p2 = pnand %p1407_p11, %p1691_p4  ;;  %p1415_p3 = scmp.lt.s32.totalorder %s1413_s15, %s1406_s9 }
  0x83   : > { %p1410_p5 = pneg %p1409_p2  ;;  %p1416_p7 = por %p1415_p3, %p1414_p0 }
  0x85   : > { %p1417_p1 = pnand %p1416_p7, %p1410_p5 }
  0x87   : > { %1420 = shalt.err (!%p1417_p1)
}
  0x88   : > { %p2042_p12 = scmp.ne.s32.totalorder %s2035_s12, 0  ;;  %p2043_p10 = scmp.ne.s32.totalorder %s2040_s7, 0 }
  0x89   : > { %s1807_s29 = sand.u32 (!%p2043_p10), 1, %s1527_s19   ;;  %p2044_p4 = scmp.ne.s32.totalorder (!%p2043_p10), %s2030_s30, 0 }
  0x8a   : > { %1216 = dma.hbm_to_vmem [thread:$0]  (!%p2042_p12), %s1784_s28, 16, %s289_s20, %s279_s17  }
  0x8b   : > { %297 = sbr.rel (%p2043_p10) target bundleno = 1627 (0x65b), region = 36  ;;  %s1810_s16 = sshll.u32 (!%p2043_p10), %s1807_s29, 2 }
  0x8c   : > { %s300_s18 = scalar_lea.sflag (!%p2043_p10), [#allocation3], %s1807_s29  ;;  %s303_s8 = scalar_lea.vmem (!%p2043_p10), [#allocation2], %s1810_s16 }
  0x92   : > { %1502 = dma.done.wait (%p2044_p4), %s300_s18, 64  }
  0x93   : > { %1504 = vsyncadd (%p2044_p4), %s300_s18, 4294967232  ;;  %s308_s12 = sand.u32 1, %s1621_s24   ;;  %s312_s20 = scalar_lea.vmem [#allocation5], %s1810_s16 }
  0x94   : > { %s309_s7 = scalar_lea.sflag [#allocation6], %s308_s12 }
  0x95   : > { %1506 = dma.done.wait (%p2044_p4), %s309_s7, 128  }
  0x96   : > { %1508 = vsyncadd (%p2044_p4), %s309_s7, 4294967168  ;;  %s321_s25 = scalar_lea.vmem [#allocation7], %s1810_s16  ;;  %s327_s28 = scalar_lea.sflag [#allocation9], %s1807_s29 }
  0x97   : > { %s329_s17 = scalar_lea.vmem [#allocation8], %s1807_s29 }
  0x98   : > { %1510 = dma.done.wait (%p2044_p4), %s327_s28, 16  }
  0x99   : > { %1512 = vsyncadd (%p2044_p4), %s327_s28, 4294967280  ;;  %v1549_v0 = vmov 0.0   ;;  %vm1550_vm0 = vmmov 0   ;;  %vm386_vm1 = vcmask 64512   ;;  %v377_v1 = vld [vmem:[%s312_s20] sm:$0xf] }
  0x9a   : > { %1144 = vmatprep.subr.bf16.mxu0 %v1549_v0  ;;  %1146 = vmatprep.mubr.msk.bf16.mxu0 %vm1550_vm0, %v1549_v0  ;;  %v391_v2 = vsel %vm386_vm1, %v377_v1, 0  ;;  %v376_v3 = vld [vmem:[%s303_s8] sm:$0xf]  ;;  %s1097_s24 = sshll.u32 %s1807_s29, 5  ;;  %v1103_v11 = vcombine.low %v377_v1, %v377_v1  ;;  %s1551_s11 = smov 120   ;;  %vm449_vm2 = vcmask 1043456  }
  0x9b   : > { %1150 = vmatprep.subr.bf16.mxu1 %v1549_v0  ;;  %1152 = vmatprep.mubr.msk.bf16.mxu1 %vm1550_vm0, %v1549_v0  ;;  %v1843_v4 = vld [vmem:[%s329_s17] ss:$0 sm:$0xff]  ;;  %s1846_s30 = scalar_lea.vmem [#allocation10], %s1097_s24  ;;  %v1102_v12 = vcombine.low %v376_v3, %v376_v3  ;;  %s1552_s27 = smov 112   ;;  %v1859_v18 = vld [vmem:[%s321_s25] sm:$0xf] }
  0x9c   : > { %1145 = vmatpush3.bf16.xpose.msra.mxu0 %v391_v2  ;;  %504 = vrot.lane.b32.xlu1 %v1103_v11, %s1551_s11  ;;  %s1553_s26 = smov 104   ;;  %v451_v19 = vsel %vm449_vm2, %v1859_v18, 0  ;;  %vm494_vm3 = vcmask 60416   ;;  %s1881_s23 = scalar_lea.vmem [#allocation11], %s1810_s16 }
  0x9d   : > { %1162 = vmatprep.subr.bf16.mxu0 %v1549_v0  ;;  %1151 = vmatpush3.bf16.msra.mxu1 %v451_v19  ;;  %s1554_s14 = smov 8   ;;  %s1555_s1 = smov 16  }
  0x9e   : > { %1156 = vmatprep.subr.bf16.mxu1 %v1549_v0  ;;  %s888_s9 = sshll.u32 %s1846_s30, 4  ;;  %s1127_s10 = sshll.u32 %s1535_s21, 9  ;;  %s1918_s9 = int_to_ptr.vmem [resolvable:$true] %s888_s9 }
  0x9f   : > { %s1924_s16 = scalar_lea.hbm %s2012_s4, %s1127_s10  ;;  %s869_s18 = scalar_lea.sflag [#allocation4], %s1807_s29 }
  0xa0   : > { %499 = vrot.lane.b32.xlu1 %v1102_v12, %s1551_s11  ;;  %s1421_s8 = scalar_lea.vmem %s1918_s9, 512  ;;  %p2045_p8 = scmp.ne.s32.totalorder %s2031_s6, 0 }
  0xa1   : > { %p1422_p7 = scmp.ne.s32.totalorder %s1918_s9, %s1421_s8  ;;  %s1556_s12 = smov [#allocation10]  }
  0xa2   : > { %s1425_s7 = sshll.u32 %s1556_s12, 4  ;;  %s1426_s7 = int_to_ptr.vmem [resolvable:$false] %s1425_s7 }
  0xa3   : > { %1147 = vmatmul.mubr.msk.bf16.vlgmr.msra.gmra.mrb[0].mxu0 %vm386_vm1, %v376_v3  ;;  %v1106_v3 = vcombine.low %v1859_v18, %v1859_v18  ;;  %p1423_p9 = pnand %p1422_p7, %p2045_p8  ;;  %s1427_s20 = scalar_lea.vmem %s1426_s7, 1024 }
  0xa4   : > { %1164 = vmatprep.mubr.msk.bf16.mxu0 %vm1550_vm0, %v1549_v0  ;;  %626 = vrot.lane.b32.xlu1 %v1102_v12, %s1552_s27  ;;  %p1428_p13 = scmp.lt.s32.totalorder %s1918_s9, %s1426_s7  ;;  %p1429_p11 = scmp.lt.s32.totalorder %s1427_s20, %s1421_s8 }
  0xa5   : > { %p1424_p6 = pneg %p1423_p9 }
  0xa6   : > { %p1430_p2 = por %p1429_p11, %p1428_p13 }
  0xa8   : > { %749 = vrot.lane.b32.xlu1 %v1103_v11, %s1553_s26  ;;  %p1431_p5 = pnand %p1430_p2, %p1424_p6 }
  0xac   : > { %747 = vrot.lane.b32.xlu1 %v1102_v12, %s1553_s26 }
 0x10e   : > { %v505_v22 = vpop.permute.xlu1 %504 }
 0x10f   : > { %v510_v24 = vsel %vm386_vm1, %v505_v22, 0 }
 0x112   : > { %v500_v26 = vpop.permute.xlu1 %499 }
 0x116   : > { %v627_v28 = vpop.permute.xlu1 %626 }
 0x11a   : > { %v750_v30 = vpop.permute.xlu1 %749 }
 0x11b   : > { %v755_v31 = vsel %vm386_vm1, %v750_v30, 0 }
 0x11e   : > { %v748_v32 = vpop.permute.xlu1 %747 }
 0x176   : > { %v427_v5 = vpop.f32.mrb[0].mxu0 }
 0x177   : > { %v428_v6 = vadd.f32 %v1843_v4, %v427_v5  ;;  %v1148_v7 = vpop.f32.mrb[1].mxu0 }
 0x178   : > { %v430_v8 = vpop.f32.mrb[2].mxu0 }
 0x179   : > { %433 = vst.msk [vmem:[%s1846_s30] sm:$0xff] %vm386_vm1, %v428_v6  ;;  %v1149_v9 = vpop.f32.mrb[3].mxu0  ;;  %v434_v10 = vsel %vm386_vm1, %v428_v6, -inf }
 0x17a   : > { %435 = vmax.xlane.f32.xlu0 %v434_v10 }
 0x207   : > { %v436_v13 = vpop.xlane.xlu0 %435 }
 0x208   : > { %v437_v14 = vsub.f32 %v428_v6, %v436_v13 }
 0x20a   : > { %v438_v15 = vmul.f32 1.442695, %v437_v14 }
 0x20c   : > { %1285 = vpow2.f32 %v438_v15 }
 0x216   : > { %v1286_v16 = vpop.eup %1285 }
 0x217   : > { %v440_v17 = vsel %vm386_vm1, %v1286_v16, 0.0 }
 0x218   : > { %441 = vadd.xlane.f32.xlu0 %v440_v17 }
 0x22e   : > { %628 = vrot.lane.b32.xlu0 %v1103_v11, %s1552_s27 }
 0x2a5   : > { %v442_v20 = vpop.xlane.xlu0 %441 }
 0x2a6   : > { %1287 = vrcp.f32 %v442_v20 }
 0x2a9   : > { %v629_v27 = vpop.permute.xlu0 %628 }
 0x2aa   : > { %v634_v29 = vsel %vm386_vm1, %v629_v27, 0 }
 0x2b0   : > { %v1288_v21 = vpop.eup %1287 }
 0x2b1   : > { %v444_v23 = vmul.f32 %v1288_v21, %v1286_v16 }
 0x2b3   : > { %v445_v25 = vpack.c.bf16 %v444_v23, %v444_v23 }
 0x2b5   : > { %1153 = vmatmul.mubr.msk.bf16.vlgmr.msra.gmra.mrb[0].mxu1 %vm386_vm1, %v445_v25 }
 0x2b6   : > { %1157 = vmatpush3.bf16.xpose.msra.mxu1 %v510_v24  ;;  %1158 = vmatprep.mubr.msk.bf16.mxu1 %vm1550_vm0, %v1549_v0 }
 0x2b7   : > { %1168 = vmatprep.subr.bf16.mxu1 %v1549_v0 }
 0x2bd   : > { %1159 = vmatmul.mubr.msk.bf16.vlgmr.msra.gmra.mrb[4].mxu1 %vm386_vm1, %v500_v26 }
 0x2be   : > { %1169 = vmatpush3.bf16.xpose.msra.mxu1 %v634_v29  ;;  %1170 = vmatprep.mubr.msk.bf16.mxu1 %vm1550_vm0, %v1549_v0 }
 0x2bf   : > { %1180 = vmatprep.subr.bf16.mxu1 %v1549_v0 }
 0x2c5   : > { %1171 = vmatmul.mubr.msk.bf16.vlgmr.msra.gmra.mrb[8].mxu1 %vm386_vm1, %v627_v28 }
 0x2c6   : > { %1181 = vmatpush3.bf16.xpose.msra.mxu1 %v755_v31  ;;  %1182 = vmatprep.mubr.msk.bf16.mxu1 %vm1550_vm0, %v1549_v0 }
 0x2cd   : > { %1183 = vmatmul.mubr.msk.bf16.vlgmr.msra.gmra.mrb[12].mxu1 %vm386_vm1, %v748_v32 }
 0x388   : > { %v487_v33 = vpop.f32.mrb[0].mxu1 }
 0x389   : > { %v493_v34 = vpack.c.bf16 %v487_v33, %v487_v33  ;;  %v1154_v35 = vpop.f32.mrb[1].mxu1 }
 0x38a   : > { %v490_v36 = vpop.f32.mrb[2].mxu1 }
 0x38b   : > { %495 = vst.msk [vmem:[%s1881_s23] sm:$0xf] %vm494_vm3, %v493_v34  ;;  %v1155_v37 = vpop.f32.mrb[3].mxu1 }
 0x390   : > { %v546_v38 = vpop.f32.mrb[4].mxu1 }
 0x391   : > { %v547_v39 = vadd.f32 %v1843_v4, %v546_v38  ;;  %v1160_v40 = vpop.f32.mrb[5].mxu1 }
 0x392   : > { %v549_v41 = vpop.f32.mrb[6].mxu1 }
 0x393   : > { %1105 = vst.msk [vmem:[%s1846_s30 + $0x8] sm:$0xff] %vm386_vm1, %v547_v39  ;;  %v1161_v42 = vpop.f32.mrb[7].mxu1  ;;  %v554_v43 = vsel %vm386_vm1, %v547_v39, -inf }
 0x394   : > { %555 = vmax.xlane.f32.xlu1 %v554_v43 }
 0x398   : > { %v670_v44 = vpop.f32.mrb[8].mxu1 }
 0x399   : > { %v671_v45 = vadd.f32 %v1843_v4, %v670_v44  ;;  %v1172_v46 = vpop.f32.mrb[9].mxu1 }
 0x39a   : > { %v673_v47 = vpop.f32.mrb[10].mxu1 }
 0x39b   : > { %1110 = vst.msk [vmem:[%s1846_s30 + $0x10] sm:$0xff] %vm386_vm1, %v671_v45  ;;  %v678_v48 = vsel %vm386_vm1, %v671_v45, -inf  ;;  %v1173_v49 = vpop.f32.mrb[11].mxu1 }
 0x39c   : > { %679 = vmax.xlane.f32.xlu0 %v678_v48 }
 0x3a0   : > { %v791_v50 = vpop.f32.mrb[12].mxu1 }
 0x3a1   : > { %v792_v51 = vadd.f32 %v1843_v4, %v791_v50  ;;  %v1184_v52 = vpop.f32.mrb[13].mxu1 }
 0x3a2   : > { %v794_v53 = vpop.f32.mrb[14].mxu1 }
 0x3a3   : > { %1114 = vst.msk [vmem:[%s1846_s30 + $0x18] sm:$0xff] %vm386_vm1, %v792_v51  ;;  %v799_v54 = vsel %vm386_vm1, %v792_v51, -inf  ;;  %v1185_v55 = vpop.f32.mrb[15].mxu1 }
 0x3a4   : > { %800 = vmax.xlane.f32.xlu1 %v799_v54 }
 0x421   : > { %v556_v56 = vpop.xlane.xlu1 %555 }
 0x422   : > { %v557_v57 = vsub.f32 %v547_v39, %v556_v56 }
 0x424   : > { %v558_v58 = vmul.f32 1.442695, %v557_v57 }
 0x426   : > { %1289 = vpow2.f32 %v558_v58 }
 0x429   : > { %v680_v59 = vpop.xlane.xlu0 %679 }
 0x42a   : > { %v681_v60 = vsub.f32 %v671_v45, %v680_v59 }
 0x42c   : > { %v682_v61 = vmul.f32 1.442695, %v681_v60 }
 0x42e   : > { %1291 = vpow2.f32 %v682_v61 }
 0x430   : > { %v1290_v62 = vpop.eup %1289 }
 0x431   : > { %v560_v63 = vsel %vm386_vm1, %v1290_v62, 0.0  ;;  %v801_v4 = vpop.xlane.xlu1 %800 }
 0x432   : > { %561 = vadd.xlane.f32.xlu1 %v560_v63  ;;  %v802_v5 = vsub.f32 %v792_v51, %v801_v4 }
 0x434   : > { %v803_v6 = vmul.f32 1.442695, %v802_v5 }
 0x436   : > { %1293 = vpow2.f32 %v803_v6 }
 0x438   : > { %v1292_v1 = vpop.eup %1291 }
 0x439   : > { %v684_v2 = vsel %vm386_vm1, %v1292_v1, 0.0 }
 0x43a   : > { %685 = vadd.xlane.f32.xlu0 %v684_v2 }
 0x440   : > { %v1294_v7 = vpop.eup %1293 }
 0x441   : > { %v805_v8 = vsel %vm386_vm1, %v1294_v7, 0.0 }
 0x443   : > { %690 = vrot.lane.b32.xlu1 %v1106_v3, %s1552_s27 }
 0x450   : > { %569 = vrot.lane.b32.xlu0 %v1106_v3, %s1551_s11 }
 0x467   : > { %806 = vadd.xlane.f32.xlu1 %v805_v8 }
 0x478   : > { %811 = vrot.lane.b32.xlu1 %v1106_v3, %s1553_s26 }
 0x4bf   : > { %v562_v9 = vpop.xlane.xlu1 %561 }
 0x4c0   : > { %1295 = vrcp.f32 %v562_v9 }
 0x4c3   : > { %v691_v15 = vpop.permute.xlu1 %690 }
 0x4c4   : > { %v696_v17 = vsel %vm449_vm2, %v691_v15, 0 }
 0x4c7   : > { %v686_v10 = vpop.xlane.xlu0 %685 }
 0x4c8   : > { %1297 = vrcp.f32 %v686_v10 }
 0x4ca   : > { %v1296_v11 = vpop.eup %1295 }
 0x4cb   : > { %v564_v12 = vmul.f32 %v1296_v11, %v1290_v62  ;;  %v570_v13 = vpop.permute.xlu0 %569 }
 0x4cc   : > { %v575_v14 = vsel %vm449_vm2, %v570_v13, 0 }
 0x4cd   : > { %1163 = vmatpush3.bf16.msra.mxu0 %v575_v14  ;;  %v565_v16 = vpack.c.bf16 %v564_v12, %v564_v12 }
 0x4ce   : > { %1174 = vmatprep.subr.bf16.mxu0 %v1549_v0 }
 0x4d0   : > { %1165 = vmatmul.mubr.msk.bf16.vlgmr.msra.gmra.mrb[4].mxu0 %vm386_vm1, %v565_v16 }
 0x4d1   : > { %1175 = vmatpush3.bf16.msra.mxu0 %v696_v17  ;;  %1176 = vmatprep.mubr.msk.bf16.mxu0 %vm1550_vm0, %v1549_v0 }
 0x4d2   : > { %v1298_v18 = vpop.eup %1297  ;;  %1186 = vmatprep.subr.bf16.mxu0 %v1549_v0 }
 0x4d3   : > { %v688_v19 = vmul.f32 %v1298_v18, %v1292_v1 }
 0x4d5   : > { %v689_v20 = vpack.c.bf16 %v688_v19, %v688_v19 }
 0x4d8   : > { %1177 = vmatmul.mubr.msk.bf16.vlgmr.msra.gmra.mrb[8].mxu0 %vm386_vm1, %v689_v20 }
 0x4d9   : > { %1188 = vmatprep.mubr.msk.bf16.mxu0 %vm1550_vm0, %v1549_v0 }
 0x4f4   : > { %v807_v21 = vpop.xlane.xlu1 %806 }
 0x4f5   : > { %1299 = vrcp.f32 %v807_v21 }
 0x4f8   : > { %v812_v22 = vpop.permute.xlu1 %811 }
 0x4f9   : > { %v817_v23 = vsel %vm449_vm2, %v812_v22, 0 }
 0x4fa   : > { %1187 = vmatpush3.bf16.msra.mxu0 %v817_v23 }
 0x4ff   : > { %v1300_v24 = vpop.eup %1299 }
 0x500   : > { %v809_v25 = vmul.f32 %v1300_v24, %v1294_v7 }
 0x502   : > { %v810_v26 = vpack.c.bf16 %v809_v25, %v809_v25 }
 0x504   : > { %1189 = vmatmul.mubr.msk.bf16.vlgmr.msra.gmra.mrb[12].mxu0 %vm386_vm1, %v810_v26 }
 0x5a3   : > { %v611_v27 = vpop.f32.mrb[4].mxu0 }
 0x5a4   : > { %v1124_v28 = vpack.c.bf16 %v611_v27, %v611_v27  ;;  %v1166_v29 = vpop.f32.mrb[5].mxu0 }
 0x5a5   : > { %v614_v30 = vpop.f32.mrb[6].mxu0 }
 0x5a6   : > { %621 = vrot.lane.b32.xlu0 %v1124_v28, %s1554_s14  ;;  %v1167_v0 = vpop.f32.mrb[7].mxu0 }
 0x5ab   : > { %v732_v31 = vpop.f32.mrb[8].mxu0 }
 0x5ac   : > { %v1125_v32 = vpack.c.bf16 %v732_v31, %v732_v31  ;;  %v1178_v33 = vpop.f32.mrb[9].mxu0 }
 0x5ad   : > { %v735_v34 = vpop.f32.mrb[10].mxu0 }
 0x5ae   : > { %742 = vrot.lane.b32.xlu1 %v1125_v32, %s1555_s1  ;;  %v1179_v35 = vpop.f32.mrb[11].mxu0 }
 0x5af   : > { %1434 = shalt.err (!%p1431_p5)
}
 0x5b0   : > { %s1435_s25 = scalar_lea.hbm %s1924_s16, 512  ;;  %s1439_s24 = scalar_lea.hbm %s2012_s4, 1024 }
 0x5b1   : > { %p1436_p0 = scmp.ne.s32.totalorder %s1924_s16, %s1435_s25  ;;  %p1440_p12 = scmp.lt.u32.totalorder %s1924_s16, %s2012_s4 }
 0x5b2   : > { %p1441_p10 = scmp.lt.u32.totalorder %s1439_s24, %s1435_s25  ;;  %p1443_p7 = scmp.lt.u32.totalorder %s1435_s25, %s1924_s16 }
 0x5b3   : > { %p1437_p3 = pnand %p1436_p0, %p2045_p8 }
 0x5b4   : > { %p1442_p4 = por %p1441_p10, %p1440_p12 }
 0x5b5   : > { %p1438_p1 = pneg %p1437_p3 }
 0x5b6   : > { %p1444_p9 = por %p1443_p7, %p1442_p4 }
 0x5b8   : > { %p1445_p6 = pnand %p1444_p9, %p1438_p1 }
 0x5ba   : > { %1448 = shalt.err (!%p1445_p6)
}
 0x5bb   : > { %s1557_s27 = smov 128   ;;  %s1558_s26 = smov 24   ;;  %vm624_vm4 = vcmask 126016   ;;  %vm745_vm5 = vcmask 191616   ;;  %vm866_vm6 = vcmask 257216  }
 0x5bc   : > { %1200 = dma.vmem_to_hbm [thread:$0]  (%p2045_p8), %s1918_s9, 512, %s1924_s16, %s869_s18, %s1557_s27, %s1557_s27, %s1554_s14  }
 0x5bd   : > { %s1121_s1 = sshll.u32 %s1535_s21, 6  ;;  %s905_s10 = sshll.u32 %s1881_s23, 4  ;;  %s1960_s10 = int_to_ptr.vmem [resolvable:$true] %s905_s10 }
 0x5be   : > { %s1958_s13 = scalar_lea.hbm %s2013_s5, %s1121_s1  ;;  %s874_s15 = scalar_lea.sflag [#allocation12], %s1807_s29 }
 0x5bf   : > { %s1449_s16 = scalar_lea.vmem %s1960_s10, 64  ;;  %s1559_s21 = smov [#allocation11]  }
 0x5c0   : > { %p1450_p13 = scmp.ne.s32.totalorder %s1960_s10, %s1449_s16  ;;  %s1453_s18 = sshll.u32 %s1559_s21, 4  ;;  %s1454_s18 = int_to_ptr.vmem [resolvable:$false] %s1453_s18 }
 0x5c1   : > { %s1455_s8 = scalar_lea.vmem %s1454_s18, 128  ;;  %p1456_p5 = scmp.lt.s32.totalorder %s1960_s10, %s1454_s18 }
 0x5c2   : > { %p1451_p11 = pnand %p1450_p13, %p2045_p8  ;;  %p1457_p0 = scmp.lt.s32.totalorder %s1455_s8, %s1449_s16 }
 0x5c4   : > { %p1452_p2 = pneg %p1451_p11  ;;  %p1458_p3 = por %p1457_p0, %p1456_p5 }
 0x5c6   : > { %p1459_p1 = pnand %p1458_p3, %p1452_p2 }
 0x5d7   : > { %v853_v36 = vpop.f32.mrb[12].mxu0 }
 0x5d8   : > { %v1126_v37 = vpack.c.bf16 %v853_v36, %v853_v36  ;;  %v1190_v38 = vpop.f32.mrb[13].mxu0 }
 0x5d9   : > { %v856_v39 = vpop.f32.mrb[14].mxu0 }
 0x5da   : > { %863 = vrot.lane.b32.xlu0 %v1126_v37, %s1558_s26  ;;  %v1191_v40 = vpop.f32.mrb[15].mxu0 }
 0x618   : > { %v622_v41 = vpop.permute.xlu0 %621 }
 0x619   : > { %625 = vst.msk [vmem:[%s1881_s23] sm:$0xf] %vm624_vm4, %v622_v41 }
 0x620   : > { %v743_v42 = vpop.permute.xlu1 %742 }
 0x621   : > { %746 = vst.msk [vmem:[%s1881_s23] sm:$0xf] %vm745_vm5, %v743_v42 }
 0x64c   : > { %v864_v43 = vpop.permute.xlu0 %863 }
 0x64d   : > { %867 = vst.msk [vmem:[%s1881_s23] sm:$0xf] %vm866_vm6, %v864_v43 }
 0x64e   : > { %1462 = shalt.err (!%p1459_p1)
}
 0x64f   : > { %s1463_s29 = scalar_lea.hbm %s1958_s13, 64  ;;  %s1467_s7 = scalar_lea.hbm %s2013_s5, 128 }
 0x650   : > { %p1464_p12 = scmp.ne.s32.totalorder %s1958_s13, %s1463_s29  ;;  %p1468_p7 = scmp.lt.u32.totalorder %s1958_s13, %s2013_s5 }
 0x651   : > { %p1469_p9 = scmp.lt.u32.totalorder %s1467_s7, %s1463_s29  ;;  %p1471_p13 = scmp.lt.u32.totalorder %s1463_s29, %s1958_s13 }
 0x652   : > { %p1465_p10 = pnand %p1464_p12, %p2045_p8 }
 0x653   : > { %p1470_p6 = por %p1469_p9, %p1468_p7 }
 0x654   : > { %p1466_p4 = pneg %p1465_p10 }
 0x655   : > { %p1472_p11 = por %p1471_p13, %p1470_p6 }
 0x657   : > { %p1473_p2 = pnand %p1472_p11, %p1466_p4 }
 0x659   : > { %1476 = shalt.err (!%p1473_p2)
}
 0x65a   : > { %1201 = dma.vmem_to_hbm [thread:$0]  (%p2045_p8), %s1960_s10, 64, %s1958_s13, %s874_s15  }
 0x65b PF: > { %s2046_s28 = sld [smem:[#allocation18_spill]]  ;;  %s2047_s17 = sld [smem:[#allocation23_spill]] }
 0x65c   : > { %s2048_s24 = sld [smem:[#allocation20_spill]] }
 0x661   : > { %s917_s30 = sand.u32 1, %s2046_s28   ;;  %p2049_p5 = scmp.ne.s32.totalorder %s2047_s17, 0 }
 0x662   : > { %p2050_p0 = scmp.ge.s32.totalorder %s2048_s24, 2  ;;  %s918_s11 = scalar_lea.sflag [#allocation4], %s917_s30 }
 0x664   : > { %p1218_p3 = pnand %p2050_p0, %p2049_p5 }
 0x666   : > { %1514 = dma.done.wait (!%p1218_p3), %s918_s11, 512  }
 0x667   : > { %1516 = vsyncadd (!%p1218_p3), %s918_s11, 4294966784  ;;  %s927_s27 = scalar_lea.sflag [#allocation12], %s917_s30 }
 0x668   : > { %1518 = dma.done.wait (!%p1218_p3), %s927_s27, 64  }
 0x669   : > { %1520 = vsyncadd (!%p1218_p3), %s927_s27, 4294967232  ;;  %s31_s23 = sadd.s32 1, %s2048_s24   ;;  %s2051_s6 = sld [smem:[#allocation19_spill]] }
 0x66a   : > { %p28_p1 = scmp.ge.s32.totalorder %s31_s23, 4   ;;  %s2052_s20 = sld [smem:[#allocation22_spill]] }
 0x66b   : > { %s2053_s26 = sld [smem:[#allocation21_spill]]  ;;  %s2054_s18 = smov %s1527_s19 }
 0x66c   : > { %s2056_s21 = smov %s1539_s22  ;;  %30 = sbr.rel (!%p28_p1) target bundleno = 14 (0xe), region = 138 }
 0x66f   : > { %s2055_s19 = smov %s2051_s6 }
 0x671   : > { %s2057_s22 = smov %s2053_s26 }
 0x673   :  { %932 = vsyncpa [#allocation3], 1 }
 0x674   :  { %934 = vsyncpa [#allocation3 + $0x1], 1 }
 0x675   :  { %935 = vsyncpa [#allocation6], 1 }
 0x676   :  { %937 = vsyncpa [#allocation6 + $0x1], 1 }
 0x677   :  { %938 = vsyncpa [#allocation9], 1 }
 0x678   :  { %940 = vsyncpa [#allocation9 + $0x1], 1 }
 0x679   :  { %941 = vsyncpa [#allocation4], 1 }
 0x67a   :  { %943 = vsyncpa [#allocation4 + $0x1], 1 }
 0x67b   :  { %944 = vsyncpa [#allocation12], 1 }
 0x67c   :  { %946 = vsyncpa [#allocation12 + $0x1], 1 }

</bundles_post_ra>
